<compile_context>
chip_gen: v7x
topology: tpu7x:2x2x1
jax: 0.10.0
libtpu: 0.0.40
codegen_flags: <defaults>
</compile_context>

<pallas_src>
import jax
import jax.numpy as jnp
from jax import lax
from jax.experimental import pallas as pl
from jax.experimental.pallas import tpu as pltpu

EPS = 1e-5  # PyTorch BatchNorm2d default eps


def _round_up(x, m):
    return (x + m - 1) // m * m


def _vmem_limit_bytes():
    # Per-generation scoped-VMEM budget: ~3/4 of physical, capped at 96 MiB
    # (v5e/v6e: 128 MiB physical -> 96 MiB; v7x: 64 MiB -> 48 MiB).
    try:
        cap = pltpu.get_tpu_info().vmem_capacity_bytes
    except Exception:
        cap = 64 * 1024 * 1024
    return int(min(cap * 3 // 4, 96 * 1024 * 1024))


def conv_block_vggnet(x, w, b, gamma, beta, *, compute_dtype=jnp.bfloat16, tn=None):
    """x: (N, Cin, H, W); w: (Cout, Cin, 3, 3); b/gamma/beta: (Cout,). Returns NCHW."""
    del b  # exactly cancelled by training-mode BN mean subtraction
    N, Cin, H, W = x.shape
    Cout = w.shape[0]
    Q = H * W

    op_dtype = jnp.dtype(compute_dtype)          # MXU operand + y-intermediate dtype
    y_dtype = op_dtype
    cin_align = 16 if op_dtype == jnp.bfloat16 else 8
    Cin_p = _round_up(Cin, cin_align)            # sublane-aligned K for the MXU
    Cp = _round_up(Cout, 128)                    # lane-dense conv-output channels

    # Cout tile: full Cp when small (weights fully resident, n_c == 1);
    # cap at 256 for very wide layers (v7x 64 MiB VMEM).
    if tn is None:
        tn = Cp if Cp <= 512 else 256
    tn = max(128, _round_up(min(tn, Cp), 128))
    while Cp % tn != 0:
        tn -= 128
    n_c = Cp // tn

    vmem_limit = _vmem_limit_bytes()

    # ---- XLA prep (cheap, no im2col): NHWC, 1px spatial zero-pad, channel align ----
    x_nhwc = jnp.transpose(x, (0, 2, 3, 1)).astype(op_dtype)
    x_pad = jnp.pad(x_nhwc, ((0, 0), (1, 1), (1, 1), (0, Cin_p - Cin)))

    # weights: (Cout, Cin, 3, 3) -> (ky, kx, Cin, Cout) -> (9, Cin_p, Cp)
    w4 = jnp.transpose(w, (2, 3, 1, 0)).astype(op_dtype)
    w4 = jnp.pad(w4, ((0, 0), (0, 0), (0, Cin_p - Cin), (0, Cp - Cout)))
    w9 = w4.reshape(9, Cin_p, Cp)

    # ------------------------------------------------------------------
    # pass 1: 3x3 conv as 9 shifted matmuls + on-chip BN partial stats
    # grid = (Cout tiles [outer, parallel], images [inner, arbitrary])
    # ------------------------------------------------------------------
    # TODO(synk): for very large images (e.g. 224x224x64) add row-band tiling of
    # the image with a 2-row halo DMA so the f32 accumulator / y block stay small.
    def conv_stats_kernel(x_ref, w_ref, y_ref, stats_ref):
        i = pl.program_id(1)  # image index (inner, "arbitrary")

        @pl.when(i == 0)
        def _init():
            stats_ref[...] = jnp.zeros_like(stats_ref)

        xb = x_ref[...]                      # (H+2, W+2, Cin_p), op_dtype
        wb = w_ref[...]                      # (9, Cin_p, tn),    op_dtype

        # 9 shifted (Q, Cin_p) @ (Cin_p, tn) MXU matmuls, f32 accumulation.
        # (On v7x the MRB keeps this accumulation in the MXU result buffer;
        #  on v5e/v6e it is an f32 VMEM/vreg accumulator.)
        acc = jnp.zeros((Q, tn), jnp.float32)
        for t in range(9):
            dy, dx = t // 3, t % 3
            xt = xb[dy:dy + H, dx:dx + W, :].reshape(Q, Cin_p)
            acc = acc + jnp.dot(xt, wb[t], preferred_element_type=jnp.float32)

        y_ref[...] = acc.astype(y_ref.dtype)

        # Per-channel sum / sum-of-squares ride VPU/XLU slack while the kernel
        # is MXU/DMA bound; accumulated on-chip across the image sweep
        # (stats block index is independent of i -> resident accumulator).
        s = jnp.sum(acc, axis=0, keepdims=True)         # (1, tn)
        ss = jnp.sum(acc * acc, axis=0, keepdims=True)  # (1, tn)
        stats_ref[...] += jnp.concatenate([s, ss], axis=0)

    flops = 2 * N * Q * 9 * Cin_p * Cp
    bytes_accessed = (n_c * N * (H + 2) * (W + 2) * Cin_p * op_dtype.itemsize
                      + 9 * Cin_p * Cp * op_dtype.itemsize
                      + N * Q * Cp * jnp.dtype(y_dtype).itemsize
                      + 2 * Cp * 4)

    y, stats = pl.pallas_call(
        conv_stats_kernel,
        out_shape=(
            jax.ShapeDtypeStruct((N, Q, Cp), y_dtype),
            jax.ShapeDtypeStruct((2, Cp), jnp.float32),
        ),
        grid=(n_c, N),
        in_specs=[
            pl.BlockSpec((None, H + 2, W + 2, Cin_p), lambda j, i: (i, 0, 0, 0)),
            pl.BlockSpec((9, Cin_p, tn), lambda j, i: (0, 0, j)),  # resident per j
        ],
        out_specs=(
            pl.BlockSpec((None, Q, tn), lambda j, i: (i, 0, j)),
            pl.BlockSpec((2, tn), lambda j, i: (0, j)),
        ),
        compiler_params=pltpu.CompilerParams(
            dimension_semantics=("parallel", "arbitrary"),
            vmem_limit_bytes=vmem_limit),
        cost_estimate=pl.CostEstimate(
            flops=flops, transcendentals=0, bytes_accessed=bytes_accessed),
    )(x_pad, w9)

    # ---- tiny per-channel BN fold (length-Cp vectors, plain JAX f32) --------
    # TODO(synk): for huge N*H*W use mean-shifted / Welford-combined partials to
    # avoid E[y^2]-E[y]^2 cancellation.
    count = jnp.float32(N * Q)
    mean = stats[0] / count
    var = jnp.maximum(stats[1] / count - mean * mean, 0.0)
    gamma_p = jnp.pad(gamma.astype(jnp.float32), (0, Cp - Cout))
    beta_p = jnp.pad(beta.astype(jnp.float32), (0, Cp - Cout))
    scale = gamma_p * lax.rsqrt(var + EPS)
    shift = beta_p - mean * scale
    scale = scale.reshape(1, Cp)
    shift = shift.reshape(1, Cp)

    # ------------------------------------------------------------------
    # pass 2: streaming BN FMA + ReLU + fused transpose to channel-major
    # (own tiling: full-channel, row-banded blocks)
    # ------------------------------------------------------------------
    def bn_relu_transpose_kernel(y_ref, scale_ref, shift_ref, o_ref):
        z = y_ref[...].astype(jnp.float32) * scale_ref[...] + shift_ref[...]
        z = jnp.maximum(z, 0.0)
        # NHWC(flat) tile -> NCHW tile: transpose rides the XLU slot (free in a
        # mem-bound kernel); removes the trailing XLA transpose round-trip.
        o_ref[...] = jnp.transpose(z, (1, 0)).astype(o_ref.dtype)

    y_item = jnp.dtype(y_dtype).itemsize
    bytes_per_row = Cp * (y_item + 4)            # y read + f32 transposed write
    tq = Q
    if Q % 128 == 0:
        budget_rows = max(128, (vmem_limit // (6 * bytes_per_row)) // 128 * 128)
        cand = min(Q, budget_rows)
        while cand > 128 and Q % cand != 0:
            cand -= 128
        if Q % cand == 0:
            tq = cand
    n_q = Q // tq

    out_cq = pl.pallas_call(
        bn_relu_transpose_kernel,
        out_shape=jax.ShapeDtypeStruct((N, Cp, Q), jnp.float32),
        grid=(N, n_q),
        in_specs=[
            pl.BlockSpec((None, tq, Cp), lambda i, q: (i, q, 0)),
            pl.BlockSpec((1, Cp), lambda i, q: (0, 0)),
            pl.BlockSpec((1, Cp), lambda i, q: (0, 0)),
        ],
        out_specs=pl.BlockSpec((None, Cp, tq), lambda i, q: (i, 0, q)),
        compiler_params=pltpu.CompilerParams(
            dimension_semantics=("parallel", "parallel"),
            vmem_limit_bytes=vmem_limit),
    )(y, scale, shift)

    # (N, Cp, H*W) -> (N, Cout, H, W); the channel slice is a no-op whenever
    # Cout is already a multiple of 128 (standard deep-VGG widths).
    out = out_cq[:, :Cout, :].reshape(N, Cout, H, W)
    return out.astype(x.dtype)


def reference(x, w, b, gamma, beta):
    y = lax.conv_general_dilated(
        x, w, window_strides=(1, 1), padding=((1, 1), (1, 1)),
        dimension_numbers=("NCHW", "OIHW", "NCHW"))
    y = y + b.reshape(1, -1, 1, 1)
    mean = y.mean(axis=(0, 2, 3), keepdims=True)
    var = ((y - mean) ** 2).mean(axis=(0, 2, 3), keepdims=True)
    y = (y - mean) / jnp.sqrt(var + EPS)
    y = y * gamma.reshape(1, -1, 1, 1) + beta.reshape(1, -1, 1, 1)
    return jnp.maximum(y, 0.0)


if __name__ == "__main__":
    N, Cin, Cout, H, W = 2, 4, 8, 16, 16

    key = jax.random.PRNGKey(0)
    kx, kw, kb = jax.random.split(key, 3)

    x = jax.random.normal(kx, (N, Cin, H, W), dtype=jnp.float32)

    # Deterministic PyTorch-like init: uniform(-1/sqrt(fan_in), 1/sqrt(fan_in))
    fan_in = Cin * 3 * 3
    bound = 1.0 / (fan_in ** 0.5)
    w = jax.random.uniform(kw, (Cout, Cin, 3, 3), jnp.float32, -bound, bound)
    b = jax.random.uniform(kb, (Cout,), jnp.float32, -bound, bound)
    gamma = jnp.ones((Cout,), jnp.float32)   # BatchNorm2d weight init
    beta = jnp.zeros((Cout,), jnp.float32)   # BatchNorm2d bias init

    ref = reference(x, w, b, gamma, beta)
    fwd = jax.jit(conv_block_vggnet, static_argnames=("compute_dtype", "tn"))

    # 1) f32 MXU-operand path: validates the kernel structure to tight tolerance
    out_f32 = jax.block_until_ready(fwd(x, w, b, gamma, beta, compute_dtype=jnp.float32))
    assert out_f32.shape == (N, Cout, H, W)
    assert jnp.allclose(out_f32, ref, atol=1e-4, rtol=1e-4), "mismatch (f32 path)"

    # 2) default bf16 MXU-operand path (f32 accumulation / stats / BN): bf16-level tol
    out_bf16 = jax.block_until_ready(fwd(x, w, b, gamma, beta))
    assert out_bf16.shape == (N, Cout, H, W)
    assert jnp.allclose(out_bf16, ref, atol=3e-2, rtol=3e-2), "mismatch (bf16 path)"

    print("KERNEL_OK")
</pallas_src>

<mosaic_0001>
module attributes {stable_mosaic.version = 11 : i64} {
  func.func @conv_stats_kernel(%arg0: i32, %arg1: i32, %arg2: memref<1x18x18x8xf32, #tpu.memory_space<vmem>>, %arg3: memref<9x8x128xf32, #tpu.memory_space<vmem>>, %arg4: memref<1x256x128xf32, #tpu.memory_space<vmem>>, %arg5: memref<2x128xf32, #tpu.memory_space<vmem>>) attributes {dimension_semantics = [#tpu.dimension_semantics<parallel>, #tpu.dimension_semantics<arbitrary>], iteration_bounds = array<i64: 1, 2>, scalar_prefetch = 0 : i64, scratch_operands = 0 : i64, tpu.core_type = #tpu.core_type<tc>, window_params = [{transform_indices = @transform_0, window_bounds = array<i64: 1, 18, 18, 8>}, {transform_indices = @transform_1, window_bounds = array<i64: 9, 8, 128>}, {transform_indices = @transform_2, window_bounds = array<i64: 1, 256, 128>}, {transform_indices = @transform_3, window_bounds = array<i64: 2, 128>}]} {
    %c0_i32 = arith.constant 0 : i32
    %0 = arith.cmpi eq, %arg1, %c0_i32 : i32
    %1 = arith.extui %0 : i1 to i32
    %c0_i32_0 = arith.constant 0 : i32
    %2 = arith.cmpi ne, %1, %c0_i32_0 : i32
    scf.if %2 {
      %cst_25 = arith.constant 0.000000e+00 : f32
      %73 = vector.broadcast %cst_25 : f32 to vector<2x128xf32>
      %c0_26 = arith.constant 0 : index
      %c0_27 = arith.constant 0 : index
      %74 = vector.load %arg5[%c0_26, %c0_27] : memref<2x128xf32, #tpu.memory_space<vmem>>, vector<2x128xf32>
      tpu.vector_store %arg5[%c0_26, %c0_27], %73 {strides = array<i32>} : memref<2x128xf32, #tpu.memory_space<vmem>>, vector<2x128xf32>,
    } else {
    }
    %c0 = arith.constant 0 : index
    %c0_1 = arith.constant 0 : index
    %c0_2 = arith.constant 0 : index
    %c0_3 = arith.constant 0 : index
    %3 = vector.load %arg2[%c0, %c0_1, %c0_2, %c0_3] : memref<1x18x18x8xf32, #tpu.memory_space<vmem>>, vector<1x18x18x8xf32>
    %4 = vector.shape_cast %3 : vector<1x18x18x8xf32> to vector<18x18x8xf32>
    %c0_4 = arith.constant 0 : index
    %c0_5 = arith.constant 0 : index
    %c0_6 = arith.constant 0 : index
    %5 = vector.load %arg3[%c0_4, %c0_5, %c0_6] : memref<9x8x128xf32, #tpu.memory_space<vmem>>, vector<9x8x128xf32>
    %cst = arith.constant 0.000000e+00 : f32
    %6 = vector.broadcast %cst : f32 to vector<256x128xf32>
    %7 = vector.extract_strided_slice %4 {offsets = [0, 0, 0], sizes = [16, 16, 8], strides = [1, 1, 1]} : vector<18x18x8xf32> to vector<16x16x8xf32>
    %8 = vector.shape_cast %7 : vector<16x16x8xf32> to vector<256x8xf32>
    %9 = vector.extract_strided_slice %5 {offsets = [0, 0, 0], sizes = [1, 8, 128], strides = [1, 1, 1]} : vector<9x8x128xf32> to vector<1x8x128xf32>
    %10 = vector.shape_cast %9 : vector<1x8x128xf32> to vector<8x128xf32>
    %cst_7 = arith.constant dense<0.000000e+00> : vector<256x128xf32>
    %11 = tpu.matmul %8, %10, %cst_7 {dimension_numbers = #tpu.dot_dimension_numbers<[1], [0], [0], [1], [0, 0, 1, 1], [], []>} : vector<256x8xf32>, vector<8x128xf32>, vector<256x128xf32> -> vector<256x128xf32>
    %12 = arith.addf %6, %11 : vector<256x128xf32>
    %13 = vector.extract_strided_slice %4 {offsets = [0, 1, 0], sizes = [16, 16, 8], strides = [1, 1, 1]} : vector<18x18x8xf32> to vector<16x16x8xf32>
    %14 = vector.shape_cast %13 : vector<16x16x8xf32> to vector<256x8xf32>
    %15 = vector.extract_strided_slice %5 {offsets = [1, 0, 0], sizes = [1, 8, 128], strides = [1, 1, 1]} : vector<9x8x128xf32> to vector<1x8x128xf32>
    %16 = vector.shape_cast %15 : vector<1x8x128xf32> to vector<8x128xf32>
    %cst_8 = arith.constant dense<0.000000e+00> : vector<256x128xf32>
    %17 = tpu.matmul %14, %16, %cst_8 {dimension_numbers = #tpu.dot_dimension_numbers<[1], [0], [0], [1], [0, 0, 1, 1], [], []>} : vector<256x8xf32>, vector<8x128xf32>, vector<256x128xf32> -> vector<256x128xf32>
    %18 = arith.addf %12, %17 : vector<256x128xf32>
    %19 = vector.extract_strided_slice %4 {offsets = [0, 2, 0], sizes = [16, 16, 8], strides = [1, 1, 1]} : vector<18x18x8xf32> to vector<16x16x8xf32>
    %20 = vector.shape_cast %19 : vector<16x16x8xf32> to vector<256x8xf32>
    %21 = vector.extract_strided_slice %5 {offsets = [2, 0, 0], sizes = [1, 8, 128], strides = [1, 1, 1]} : vector<9x8x128xf32> to vector<1x8x128xf32>
    %22 = vector.shape_cast %21 : vector<1x8x128xf32> to vector<8x128xf32>
    %cst_9 = arith.constant dense<0.000000e+00> : vector<256x128xf32>
    %23 = tpu.matmul %20, %22, %cst_9 {dimension_numbers = #tpu.dot_dimension_numbers<[1], [0], [0], [1], [0, 0, 1, 1], [], []>} : vector<256x8xf32>, vector<8x128xf32>, vector<256x128xf32> -> vector<256x128xf32>
    %24 = arith.addf %18, %23 : vector<256x128xf32>
    %25 = vector.extract_strided_slice %4 {offsets = [1, 0, 0], sizes = [16, 16, 8], strides = [1, 1, 1]} : vector<18x18x8xf32> to vector<16x16x8xf32>
    %26 = vector.shape_cast %25 : vector<16x16x8xf32> to vector<256x8xf32>
    %27 = vector.extract_strided_slice %5 {offsets = [3, 0, 0], sizes = [1, 8, 128], strides = [1, 1, 1]} : vector<9x8x128xf32> to vector<1x8x128xf32>
    %28 = vector.shape_cast %27 : vector<1x8x128xf32> to vector<8x128xf32>
    %cst_10 = arith.constant dense<0.000000e+00> : vector<256x128xf32>
    %29 = tpu.matmul %26, %28, %cst_10 {dimension_numbers = #tpu.dot_dimension_numbers<[1], [0], [0], [1], [0, 0, 1, 1], [], []>} : vector<256x8xf32>, vector<8x128xf32>, vector<256x128xf32> -> vector<256x128xf32>
    %30 = arith.addf %24, %29 : vector<256x128xf32>
    %31 = vector.extract_strided_slice %4 {offsets = [1, 1, 0], sizes = [16, 16, 8], strides = [1, 1, 1]} : vector<18x18x8xf32> to vector<16x16x8xf32>
    %32 = vector.shape_cast %31 : vector<16x16x8xf32> to vector<256x8xf32>
    %33 = vector.extract_strided_slice %5 {offsets = [4, 0, 0], sizes = [1, 8, 128], strides = [1, 1, 1]} : vector<9x8x128xf32> to vector<1x8x128xf32>
    %34 = vector.shape_cast %33 : vector<1x8x128xf32> to vector<8x128xf32>
    %cst_11 = arith.constant dense<0.000000e+00> : vector<256x128xf32>
    %35 = tpu.matmul %32, %34, %cst_11 {dimension_numbers = #tpu.dot_dimension_numbers<[1], [0], [0], [1], [0, 0, 1, 1], [], []>} : vector<256x8xf32>, vector<8x128xf32>, vector<256x128xf32> -> vector<256x128xf32>
    %36 = arith.addf %30, %35 : vector<256x128xf32>
    %37 = vector.extract_strided_slice %4 {offsets = [1, 2, 0], sizes = [16, 16, 8], strides = [1, 1, 1]} : vector<18x18x8xf32> to vector<16x16x8xf32>
    %38 = vector.shape_cast %37 : vector<16x16x8xf32> to vector<256x8xf32>
    %39 = vector.extract_strided_slice %5 {offsets = [5, 0, 0], sizes = [1, 8, 128], strides = [1, 1, 1]} : vector<9x8x128xf32> to vector<1x8x128xf32>
    %40 = vector.shape_cast %39 : vector<1x8x128xf32> to vector<8x128xf32>
    %cst_12 = arith.constant dense<0.000000e+00> : vector<256x128xf32>
    %41 = tpu.matmul %38, %40, %cst_12 {dimension_numbers = #tpu.dot_dimension_numbers<[1], [0], [0], [1], [0, 0, 1, 1], [], []>} : vector<256x8xf32>, vector<8x128xf32>, vector<256x128xf32> -> vector<256x128xf32>
    %42 = arith.addf %36, %41 : vector<256x128xf32>
    %43 = vector.extract_strided_slice %4 {offsets = [2, 0, 0], sizes = [16, 16, 8], strides = [1, 1, 1]} : vector<18x18x8xf32> to vector<16x16x8xf32>
    %44 = vector.shape_cast %43 : vector<16x16x8xf32> to vector<256x8xf32>
    %45 = vector.extract_strided_slice %5 {offsets = [6, 0, 0], sizes = [1, 8, 128], strides = [1, 1, 1]} : vector<9x8x128xf32> to vector<1x8x128xf32>
    %46 = vector.shape_cast %45 : vector<1x8x128xf32> to vector<8x128xf32>
    %cst_13 = arith.constant dense<0.000000e+00> : vector<256x128xf32>
    %47 = tpu.matmul %44, %46, %cst_13 {dimension_numbers = #tpu.dot_dimension_numbers<[1], [0], [0], [1], [0, 0, 1, 1], [], []>} : vector<256x8xf32>, vector<8x128xf32>, vector<256x128xf32> -> vector<256x128xf32>
    %48 = arith.addf %42, %47 : vector<256x128xf32>
    %49 = vector.extract_strided_slice %4 {offsets = [2, 1, 0], sizes = [16, 16, 8], strides = [1, 1, 1]} : vector<18x18x8xf32> to vector<16x16x8xf32>
    %50 = vector.shape_cast %49 : vector<16x16x8xf32> to vector<256x8xf32>
    %51 = vector.extract_strided_slice %5 {offsets = [7, 0, 0], sizes = [1, 8, 128], strides = [1, 1, 1]} : vector<9x8x128xf32> to vector<1x8x128xf32>
    %52 = vector.shape_cast %51 : vector<1x8x128xf32> to vector<8x128xf32>
    %cst_14 = arith.constant dense<0.000000e+00> : vector<256x128xf32>
    %53 = tpu.matmul %50, %52, %cst_14 {dimension_numbers = #tpu.dot_dimension_numbers<[1], [0], [0], [1], [0, 0, 1, 1], [], []>} : vector<256x8xf32>, vector<8x128xf32>, vector<256x128xf32> -> vector<256x128xf32>
    %54 = arith.addf %48, %53 : vector<256x128xf32>
    %55 = vector.extract_strided_slice %4 {offsets = [2, 2, 0], sizes = [16, 16, 8], strides = [1, 1, 1]} : vector<18x18x8xf32> to vector<16x16x8xf32>
    %56 = vector.shape_cast %55 : vector<16x16x8xf32> to vector<256x8xf32>
    %57 = vector.extract_strided_slice %5 {offsets = [8, 0, 0], sizes = [1, 8, 128], strides = [1, 1, 1]} : vector<9x8x128xf32> to vector<1x8x128xf32>
    %58 = vector.shape_cast %57 : vector<1x8x128xf32> to vector<8x128xf32>
    %cst_15 = arith.constant dense<0.000000e+00> : vector<256x128xf32>
    %59 = tpu.matmul %56, %58, %cst_15 {dimension_numbers = #tpu.dot_dimension_numbers<[1], [0], [0], [1], [0, 0, 1, 1], [], []>} : vector<256x8xf32>, vector<8x128xf32>, vector<256x128xf32> -> vector<256x128xf32>
    %60 = arith.addf %54, %59 : vector<256x128xf32>
    %c0_16 = arith.constant 0 : index
    %c0_17 = arith.constant 0 : index
    %c0_18 = arith.constant 0 : index
    %61 = vector.load %arg4[%c0_16, %c0_17, %c0_18] : memref<1x256x128xf32, #tpu.memory_space<vmem>>, vector<1x256x128xf32>
    %62 = vector.shape_cast %61 : vector<1x256x128xf32> to vector<256x128xf32>
    %63 = vector.shape_cast %60 : vector<256x128xf32> to vector<1x256x128xf32>
    tpu.vector_store %arg4[%c0_16, %c0_17, %c0_18], %63 {strides = array<i32>} : memref<1x256x128xf32, #tpu.memory_space<vmem>>, vector<1x256x128xf32>,
    %cst_19 = arith.constant dense<0.000000e+00> : vector<128xf32>
    %64 = vector.multi_reduction <add>, %60, %cst_19 [0] : vector<256x128xf32> to vector<128xf32>
    %65 = vector.shape_cast %64 : vector<128xf32> to vector<1x128xf32>
    %66 = arith.mulf %60, %60 : vector<256x128xf32>
    %cst_20 = arith.constant dense<0.000000e+00> : vector<128xf32>
    %67 = vector.multi_reduction <add>, %66, %cst_20 [0] : vector<256x128xf32> to vector<128xf32>
    %68 = vector.shape_cast %67 : vector<128xf32> to vector<1x128xf32>
    %c0_21 = arith.constant 0 : index
    %c0_22 = arith.constant 0 : index
    %69 = vector.load %arg5[%c0_21, %c0_22] : memref<2x128xf32, #tpu.memory_space<vmem>>, vector<2x128xf32>
    %70 = tpu.concatenate %65, %68 in 0 : vector<1x128xf32>, vector<1x128xf32> -> vector<2x128xf32>
    %71 = arith.addf %69, %70 : vector<2x128xf32>
    %c0_23 = arith.constant 0 : index
    %c0_24 = arith.constant 0 : index
    %72 = vector.load %arg5[%c0_23, %c0_24] : memref<2x128xf32, #tpu.memory_space<vmem>>, vector<2x128xf32>
    tpu.vector_store %arg5[%c0_23, %c0_24], %71 {strides = array<i32>} : memref<2x128xf32, #tpu.memory_space<vmem>>, vector<2x128xf32>,
    return
  }
  func.func @transform_0(%arg0: i32, %arg1: i32) -> (i32, i32, i32, i32) {
    %c0_i32 = arith.constant 0 : i32
    %c0_i32_0 = arith.constant 0 : i32
    %c0_i32_1 = arith.constant 0 : i32
    %c0_i32_2 = arith.constant 0 : i32
    return %arg1, %c0_i32, %c0_i32_0, %c0_i32_1 : i32, i32, i32, i32
  }
  func.func @transform_1(%arg0: i32, %arg1: i32) -> (i32, i32, i32) {
    %c0_i32 = arith.constant 0 : i32
    %c0_i32_0 = arith.constant 0 : i32
    %c0_i32_1 = arith.constant 0 : i32
    return %c0_i32, %c0_i32_0, %arg0 : i32, i32, i32
  }
  func.func @transform_2(%arg0: i32, %arg1: i32) -> (i32, i32, i32) {
    %c0_i32 = arith.constant 0 : i32
    %c0_i32_0 = arith.constant 0 : i32
    return %arg1, %c0_i32, %arg0 : i32, i32, i32
  }
  func.func @transform_3(%arg0: i32, %arg1: i32) -> (i32, i32) {
    %c0_i32 = arith.constant 0 : i32
    %c0_i32_0 = arith.constant 0 : i32
    return %c0_i32, %arg0 : i32, i32
  }
}

module attributes {stable_mosaic.version = 11 : i64} {
  func.func @bn_relu_transpose_kernel(%arg0: i32, %arg1: i32, %arg2: memref<1x256x128xf32, #tpu.memory_space<vmem>>, %arg3: memref<1x128xf32, #tpu.memory_space<vmem>>, %arg4: memref<1x128xf32, #tpu.memory_space<vmem>>, %arg5: memref<1x128x256xf32, #tpu.memory_space<vmem>>) attributes {dimension_semantics = [#tpu.dimension_semantics<parallel>, #tpu.dimension_semantics<parallel>], iteration_bounds = array<i64: 2, 1>, scalar_prefetch = 0 : i64, scratch_operands = 0 : i64, tpu.core_type = #tpu.core_type<tc>, window_params = [{transform_indices = @transform_0, window_bounds = array<i64: 1, 256, 128>}, {pipeline_mode = #tpu.pipeline_mode<synchronous>, transform_indices = @transform_1, window_bounds = array<i64: 1, 128>}, {pipeline_mode = #tpu.pipeline_mode<synchronous>, transform_indices = @transform_2, window_bounds = array<i64: 1, 128>}, {transform_indices = @transform_3, window_bounds = array<i64: 1, 128, 256>}]} {
    %c0 = arith.constant 0 : index
    %c0_0 = arith.constant 0 : index
    %c0_1 = arith.constant 0 : index
    %0 = vector.load %arg2[%c0, %c0_0, %c0_1] : memref<1x256x128xf32, #tpu.memory_space<vmem>>, vector<1x256x128xf32>
    %1 = vector.shape_cast %0 : vector<1x256x128xf32> to vector<256x128xf32>
    %c0_2 = arith.constant 0 : index
    %c0_3 = arith.constant 0 : index
    %2 = vector.load %arg3[%c0_2, %c0_3] : memref<1x128xf32, #tpu.memory_space<vmem>>, vector<1x128xf32>
    %3 = vector.broadcast %2 : vector<1x128xf32> to vector<256x128xf32>
    %4 = arith.mulf %1, %3 : vector<256x128xf32>
    %c0_4 = arith.constant 0 : index
    %c0_5 = arith.constant 0 : index
    %5 = vector.load %arg4[%c0_4, %c0_5] : memref<1x128xf32, #tpu.memory_space<vmem>>, vector<1x128xf32>
    %6 = vector.broadcast %5 : vector<1x128xf32> to vector<256x128xf32>
    %7 = arith.addf %4, %6 : vector<256x128xf32>
    %cst = arith.constant 0.000000e+00 : f32
    %8 = vector.broadcast %cst : f32 to vector<256x128xf32>
    %9 = arith.maximumf %7, %8 : vector<256x128xf32>
    %10 = tpu.transpose %9, [1, 0] : vector<256x128xf32> -> vector<128x256xf32>
    %c0_6 = arith.constant 0 : index
    %c0_7 = arith.constant 0 : index
    %c0_8 = arith.constant 0 : index
    %11 = vector.load %arg5[%c0_6, %c0_7, %c0_8] : memref<1x128x256xf32, #tpu.memory_space<vmem>>, vector<1x128x256xf32>
    %12 = vector.shape_cast %11 : vector<1x128x256xf32> to vector<128x256xf32>
    %13 = vector.shape_cast %10 : vector<128x256xf32> to vector<1x128x256xf32>
    tpu.vector_store %arg5[%c0_6, %c0_7, %c0_8], %13 {strides = array<i32>} : memref<1x128x256xf32, #tpu.memory_space<vmem>>, vector<1x128x256xf32>,
    return
  }
  func.func @transform_0(%arg0: i32, %arg1: i32) -> (i32, i32, i32) {
    %c0_i32 = arith.constant 0 : i32
    %c0_i32_0 = arith.constant 0 : i32
    return %arg0, %arg1, %c0_i32 : i32, i32, i32
  }
  func.func @transform_1(%arg0: i32, %arg1: i32) -> (i32, i32) {
    %c0_i32 = arith.constant 0 : i32
    %c0_i32_0 = arith.constant 0 : i32
    %c0_i32_1 = arith.constant 0 : i32
    return %c0_i32, %c0_i32_0 : i32, i32
  }
  func.func @transform_2(%arg0: i32, %arg1: i32) -> (i32, i32) {
    %c0_i32 = arith.constant 0 : i32
    %c0_i32_0 = arith.constant 0 : i32
    %c0_i32_1 = arith.constant 0 : i32
    return %c0_i32, %c0_i32_0 : i32, i32
  }
  func.func @transform_3(%arg0: i32, %arg1: i32) -> (i32, i32, i32) {
    %c0_i32 = arith.constant 0 : i32
    %c0_i32_0 = arith.constant 0 : i32
    return %arg0, %c0_i32, %arg1 : i32, i32, i32
  }
}

</mosaic_0001>

<bundles_post_ra>
// kernel: conv_block_vggnet.3
= control target key start
LH: loop header
LB: loop body
LE: loop exit
PB: predicated region body
PF: predicated region fallthrough
CT: control target
= control target key end

     0   :  { %s618_s12 = smov 0   ;;  %s620_s13 = smov 0   ;;  %s800_s0 = inlined_call_operand.vmem [shape: f32[2,256,128], index: 0, kind: input, shape index: {}]   ;;  %s801_s1 = inlined_call_operand.vmem [shape: f32[1,128], index: 1, kind: input, shape index: {}]   ;;  %s802_s2 = inlined_call_operand.vmem [shape: f32[1,128], index: 2, kind: input, shape index: {}]   ;;  %s803_s3 = inlined_call_operand.vmem [shape: f32[2,128,256], index: 3, kind: output, shape index: {}]  }
   0x1   :  { %s622_s14 = smov 0  }
   0x2 LB: > { %s25_s15 = sadd.s32 1, %s592_s13  ;;  %p539_p0 = scmp.ge.s32.totalorder %s596_s14, 1  ;;  %s596_s14 = sphi %s622_s14, %s13_s14   ;;  %s592_s13 = sphi %s620_s13, %s805_s13   ;;  %s588_s12 = sphi %s618_s12, %s804_s12  }
   0x3   : > { %p27_p1 = scmp.ge.s32.totalorder %s25_s15, 2  ;;  %p158_p2 = scmp.lt.s32.totalorder %s596_s14, 3 }
   0x5   : > { %s807_s15 = smov (%p27_p1, %s25_s15), 0  ;;  %p159_p3 = pnand %p539_p0, %p158_p2 }
   0x6   : > { %p191_p4 = scmp.lt.s32.totalorder (!%p159_p3), %s588_s12, 1  ;;  %v642_v0 = vld [vmem:[%s801_s1] ss:$0 sm:$0xff] (!%p159_p3) }
   0x7   : > { %162 = sbr.rel (%p159_p3) target bundleno = 215 (0xd7), region = 32  ;;  %v654_v1 = vld [vmem:[%s802_s2] ss:$0 sm:$0xff] (!%p159_p3) }
   0xe   : > { %s809_s12 = smov (!%p191_p4, %s588_s12), 1 }
   0xf   : > { %s548_s16 = sshll.u32 %s809_s12, 8 }
  0x10   : > { %s649_s21 = scalar_lea.vmem %s800_s0, %s548_s16  ;;  %s757_s26 = scalar_lea.vmem %s803_s3, %s548_s16 }
  0x11   : > { %v226_v2 = vld [vmem:[%s649_s21 + $0x80] sm:$0xff]  ;;  %v227_v4 = vld [vmem:[%s649_s21 + $0x88] sm:$0xff]  ;;  %v228_v9 = vld [vmem:[%s649_s21 + $0x90] sm:$0xff] }
  0x12   : > { %v210_v3 = vld [vmem:[%s649_s21] sm:$0xff]  ;;  %v265_v5 = vmul.f32 %v642_v0, %v226_v2  ;;  %v266_v7 = vmul.f32 %v642_v0, %v227_v4  ;;  %v211_v8 = vld [vmem:[%s649_s21 + $0x8] sm:$0xff]  ;;  %v212_v10 = vld [vmem:[%s649_s21 + $0x10] sm:$0xff]  ;;  %v267_v12 = vmul.f32 %v642_v0, %v228_v9 }
  0x13   : > { %v249_v6 = vmul.f32 %v642_v0, %v210_v3  ;;  %v250_v11 = vmul.f32 %v642_v0, %v211_v8  ;;  %v251_v16 = vmul.f32 %v642_v0, %v212_v10  ;;  %v229_v17 = vld [vmem:[%s649_s21 + $0x98] sm:$0xff]  ;;  %v230_v28 = vld [vmem:[%s649_s21 + $0xa0] sm:$0xff]  ;;  %v231_v36 = vld [vmem:[%s649_s21 + $0xa8] sm:$0xff] }
  0x14   : > { %v304_v13 = vadd.f32 %v654_v1, %v265_v5  ;;  %v305_v15 = vadd.f32 %v654_v1, %v266_v7  ;;  %v213_v19 = vld [vmem:[%s649_s21 + $0x18] sm:$0xff]  ;;  %v306_v22 = vadd.f32 %v654_v1, %v267_v12  ;;  %v268_v23 = vmul.f32 %v642_v0, %v229_v17  ;;  %v214_v29 = vld [vmem:[%s649_s21 + $0x20] sm:$0xff]  ;;  %v215_v37 = vld [vmem:[%s649_s21 + $0x28] sm:$0xff] }
  0x15   : > { %v288_v14 = vadd.f32 %v654_v1, %v249_v6  ;;  %v289_v18 = vadd.f32 %v654_v1, %v250_v11  ;;  %v290_v26 = vadd.f32 %v654_v1, %v251_v16  ;;  %v252_v27 = vmul.f32 %v642_v0, %v213_v19  ;;  %v232_v44 = vld [vmem:[%s649_s21 + $0xb0] sm:$0xff]  ;;  %v233_v52 = vld [vmem:[%s649_s21 + $0xb8] sm:$0xff]  ;;  %v234_v60 = vld [vmem:[%s649_s21 + $0xc0] sm:$0xff] }
  0x16   : > { %v336_v20 = vmax.f32 %v304_v13, 0.0  ;;  %v337_v24 = vmax.f32 %v305_v15, 0.0  ;;  %v338_v30 = vmax.f32 %v306_v22, 0.0  ;;  %v307_v31 = vadd.f32 %v654_v1, %v268_v23  ;;  %v216_v45 = vld [vmem:[%s649_s21 + $0x30] sm:$0xff]  ;;  %v217_v53 = vld [vmem:[%s649_s21 + $0x38] sm:$0xff]  ;;  %v218_v61 = vld [vmem:[%s649_s21 + $0x40] sm:$0xff] }
  0x17   : > { %v320_v21 = vmax.f32 %v288_v14, 0.0  ;;  %v321_v25 = vmax.f32 %v289_v18, 0.0  ;;  %v322_v32 = vmax.f32 %v290_v26, 0.0  ;;  %v291_v33 = vadd.f32 %v654_v1, %v252_v27  ;;  %v235_v6 = vld [vmem:[%s649_s21 + $0xc8] sm:$0xff]  ;;  %v236_v14 = vld [vmem:[%s649_s21 + $0xd0] sm:$0xff]  ;;  %v237_v22 = vld [vmem:[%s649_s21 + $0xd8] sm:$0xff] }
  0x18   : > { %384 = vxpose.xlu1.b32.start [1/16] %v336_v20, 128  ;;  %v269_v34 = vmul.f32 %v642_v0, %v230_v28  ;;  %v253_v35 = vmul.f32 %v642_v0, %v214_v29  ;;  %v339_v38 = vmax.f32 %v307_v31, 0.0  ;;  %v270_v39 = vmul.f32 %v642_v0, %v231_v36  ;;  %v219_v7 = vld [vmem:[%s649_s21 + $0x48] sm:$0xff]  ;;  %v220_v15 = vld [vmem:[%s649_s21 + $0x50] sm:$0xff]  ;;  %v221_v23 = vld [vmem:[%s649_s21 + $0x58] sm:$0xff] }
  0x19   : > { %352 = vxpose.xlu0.b32.start [1/16] %v320_v21, 128  ;;  %v323_v40 = vmax.f32 %v291_v33, 0.0  ;;  %v254_v43 = vmul.f32 %v642_v0, %v215_v37  ;;  %v271_v46 = vmul.f32 %v642_v0, %v232_v44  ;;  %v255_v47 = vmul.f32 %v642_v0, %v216_v45  ;;  %v222_v31 = vld [vmem:[%s649_s21 + $0x60] sm:$0xff] }
  0x1a   : > { %v308_v41 = vadd.f32 %v654_v1, %v269_v34  ;;  %v292_v42 = vadd.f32 %v654_v1, %v253_v35  ;;  %v309_v50 = vadd.f32 %v654_v1, %v270_v39  ;;  %v272_v55 = vmul.f32 %v642_v0, %v233_v52  ;;  %v223_v39 = vld [vmem:[%s649_s21 + $0x68] sm:$0xff] }
  0x1b   : > { %v293_v51 = vadd.f32 %v654_v1, %v254_v43  ;;  %v310_v54 = vadd.f32 %v654_v1, %v271_v46  ;;  %v294_v58 = vadd.f32 %v654_v1, %v255_v47  ;;  %v256_v59 = vmul.f32 %v642_v0, %v217_v53  ;;  %v240_v46 = vld [vmem:[%s649_s21 + $0xf0] sm:$0xff] }
  0x1c   : > { %385 = vxpose.xlu1.b32.cont [2/16] %v337_v24, 128  ;;  %v340_v48 = vmax.f32 %v308_v41, 0.0  ;;  %v324_v49 = vmax.f32 %v292_v42, 0.0  ;;  %v341_v56 = vmax.f32 %v309_v50, 0.0  ;;  %v311_v63 = vadd.f32 %v654_v1, %v272_v55  ;;  %v224_v47 = vld [vmem:[%s649_s21 + $0x70] sm:$0xff]  ;;  %v225_v55 = vld [vmem:[%s649_s21 + $0x78] sm:$0xff] }
  0x1d   : > { %353 = vxpose.xlu0.b32.cont [2/16] %v321_v25, 128  ;;  %v325_v57 = vmax.f32 %v293_v51, 0.0  ;;  %v342_v62 = vmax.f32 %v310_v54, 0.0  ;;  %v326_v2 = vmax.f32 %v294_v58, 0.0  ;;  %v295_v3 = vadd.f32 %v654_v1, %v256_v59  ;;  %v241_v54 = vld [vmem:[%s649_s21 + $0xf8] sm:$0xff] }
  0x1e   : > { %v273_v4 = vmul.f32 %v642_v0, %v234_v60  ;;  %v257_v5 = vmul.f32 %v642_v0, %v218_v61  ;;  %v343_v8 = vmax.f32 %v311_v63, 0.0  ;;  %v274_v9 = vmul.f32 %v642_v0, %v235_v6 }
  0x1f   : > { %v327_v10 = vmax.f32 %v295_v3, 0.0  ;;  %v258_v13 = vmul.f32 %v642_v0, %v219_v7  ;;  %v275_v16 = vmul.f32 %v642_v0, %v236_v14  ;;  %v259_v17 = vmul.f32 %v642_v0, %v220_v15 }
  0x20   : > { %386 = vxpose.xlu1.b32.cont [3/16] %v338_v30, 128  ;;  %v312_v11 = vadd.f32 %v654_v1, %v273_v4  ;;  %v296_v12 = vadd.f32 %v654_v1, %v257_v5  ;;  %v313_v20 = vadd.f32 %v654_v1, %v274_v9  ;;  %v276_v25 = vmul.f32 %v642_v0, %v237_v22  ;;  %v238_v30 = vld [vmem:[%s649_s21 + $0xe0] sm:$0xff] }
  0x21   : > { %354 = vxpose.xlu0.b32.cont [3/16] %v322_v32, 128  ;;  %v297_v21 = vadd.f32 %v654_v1, %v258_v13  ;;  %v314_v24 = vadd.f32 %v654_v1, %v275_v16  ;;  %v298_v28 = vadd.f32 %v654_v1, %v259_v17  ;;  %v260_v29 = vmul.f32 %v642_v0, %v221_v23 }
  0x22   : > { %v344_v18 = vmax.f32 %v312_v11, 0.0  ;;  %v328_v19 = vmax.f32 %v296_v12, 0.0  ;;  %v345_v26 = vmax.f32 %v313_v20, 0.0  ;;  %v315_v33 = vadd.f32 %v654_v1, %v276_v25 }
  0x23   : > { %v329_v27 = vmax.f32 %v297_v21, 0.0  ;;  %v346_v32 = vmax.f32 %v314_v24, 0.0  ;;  %v330_v34 = vmax.f32 %v298_v28, 0.0  ;;  %v299_v35 = vadd.f32 %v654_v1, %v260_v29 }
  0x24   : > { %387 = vxpose.xlu1.b32.cont [4/16] %v339_v38, 128  ;;  %v277_v36 = vmul.f32 %v642_v0, %v238_v30  ;;  %v261_v37 = vmul.f32 %v642_v0, %v222_v31  ;;  %v239_v38 = vld [vmem:[%s649_s21 + $0xe8] sm:$0xff]  ;;  %v262_v45 = vmul.f32 %v642_v0, %v223_v39  ;;  %v264_v61 = vmul.f32 %v642_v0, %v225_v55 }
  0x25   : > { %355 = vxpose.xlu0.b32.cont [4/16] %v323_v40, 128  ;;  %v347_v40 = vmax.f32 %v315_v33, 0.0  ;;  %v278_v41 = vmul.f32 %v642_v0, %v239_v38  ;;  %v331_v42 = vmax.f32 %v299_v35, 0.0 }
  0x26   : > { %v316_v43 = vadd.f32 %v654_v1, %v277_v36  ;;  %v300_v44 = vadd.f32 %v654_v1, %v261_v37  ;;  %v301_v53 = vadd.f32 %v654_v1, %v262_v45  ;;  %v303_v3 = vadd.f32 %v654_v1, %v264_v61 }
  0x27   : > { %v317_v52 = vadd.f32 %v654_v1, %v278_v41 }
  0x28   : > { %388 = vxpose.xlu1.b32.cont [5/16] %v340_v48, 128  ;;  %v279_v48 = vmul.f32 %v642_v0, %v240_v46  ;;  %v348_v50 = vmax.f32 %v316_v43, 0.0  ;;  %v332_v51 = vmax.f32 %v300_v44, 0.0  ;;  %v333_v59 = vmax.f32 %v301_v53, 0.0 }
  0x29   : > { %356 = vxpose.xlu0.b32.cont [5/16] %v324_v49, 128  ;;  %v263_v49 = vmul.f32 %v642_v0, %v224_v47  ;;  %v349_v58 = vmax.f32 %v317_v52, 0.0  ;;  %v335_v5 = vmax.f32 %v303_v3, 0.0 }
  0x2b   : > { %v302_v60 = vadd.f32 %v654_v1, %v263_v49 }
  0x2c   : > { %389 = vxpose.xlu1.b32.cont [6/16] %v341_v56, 128  ;;  %v318_v56 = vadd.f32 %v654_v1, %v279_v48 }
  0x2d   : > { %357 = vxpose.xlu0.b32.cont [6/16] %v325_v57, 128  ;;  %v280_v57 = vmul.f32 %v642_v0, %v241_v54  ;;  %v334_v63 = vmax.f32 %v302_v60, 0.0 }
  0x30   : > { %390 = vxpose.xlu1.b32.cont [7/16] %v342_v62, 128  ;;  %v350_v62 = vmax.f32 %v318_v56, 0.0 }
  0x31   : > { %358 = vxpose.xlu0.b32.cont [7/16] %v326_v2, 128  ;;  %v319_v2 = vadd.f32 %v654_v1, %v280_v57 }
  0x33   : > { %v351_v4 = vmax.f32 %v319_v2, 0.0 }
  0x34   : > { %391 = vxpose.xlu1.b32.cont [8/16] %v343_v8, 128 }
  0x35   : > { %359 = vxpose.xlu0.b32.cont [8/16] %v327_v10, 128 }
  0x38   : > { %392 = vxpose.xlu1.b32.cont [9/16] %v344_v18, 128 }
  0x39   : > { %360 = vxpose.xlu0.b32.cont [9/16] %v328_v19, 128 }
  0x3c   : > { %393 = vxpose.xlu1.b32.cont [10/16] %v345_v26, 128 }
  0x3d   : > { %361 = vxpose.xlu0.b32.cont [10/16] %v329_v27, 128 }
  0x40   : > { %394 = vxpose.xlu1.b32.cont [11/16] %v346_v32, 128 }
  0x41   : > { %362 = vxpose.xlu0.b32.cont [11/16] %v330_v34, 128 }
  0x44   : > { %395 = vxpose.xlu1.b32.cont [12/16] %v347_v40, 128 }
  0x45   : > { %363 = vxpose.xlu0.b32.cont [12/16] %v331_v42, 128 }
  0x48   : > { %396 = vxpose.xlu1.b32.cont [13/16] %v348_v50, 128 }
  0x49   : > { %364 = vxpose.xlu0.b32.cont [13/16] %v332_v51, 128 }
  0x4c   : > { %397 = vxpose.xlu1.b32.cont [14/16] %v349_v58, 128 }
  0x4d   : > { %365 = vxpose.xlu0.b32.cont [14/16] %v333_v59, 128 }
  0x50   : > { %398 = vxpose.xlu1.b32.cont [15/16] %v350_v62, 128 }
  0x51   : > { %366 = vxpose.xlu0.b32.cont [15/16] %v334_v63, 128 }
  0x54   : > { %399 = vxpose.xlu1.b32.end [16/16] %v351_v4, 128 }
  0x55   : > { %367 = vxpose.xlu0.b32.end [16/16] %v335_v5, 128 }
  0x98   : > { %v400_v0 = vpop.trf.xlu1 }
  0x99   : > { %v368_v1 = vpop.trf.xlu0  ;;  %417 = vst [vmem:[%s757_s26 + $0x8] sm:$0xff] %v400_v0 }
  0x9a   : > { %416 = vst [vmem:[%s757_s26] sm:$0xff] %v368_v1 }
  0x9c   : > { %v401_v6 = vpop.trf.xlu1 }
  0x9d   : > { %v369_v7 = vpop.trf.xlu0  ;;  %419 = vst [vmem:[%s757_s26 + $0x18] sm:$0xff] %v401_v6 }
  0x9e   : > { %418 = vst [vmem:[%s757_s26 + $0x10] sm:$0xff] %v369_v7 }
  0xa0   : > { %v402_v8 = vpop.trf.xlu1 }
  0xa1   : > { %v370_v9 = vpop.trf.xlu0  ;;  %421 = vst [vmem:[%s757_s26 + $0x28] sm:$0xff] %v402_v8 }
  0xa2   : > { %420 = vst [vmem:[%s757_s26 + $0x20] sm:$0xff] %v370_v9 }
  0xa4   : > { %v403_v10 = vpop.trf.xlu1 }
  0xa5   : > { %v371_v11 = vpop.trf.xlu0  ;;  %423 = vst [vmem:[%s757_s26 + $0x38] sm:$0xff] %v403_v10 }
  0xa6   : > { %422 = vst [vmem:[%s757_s26 + $0x30] sm:$0xff] %v371_v11 }
  0xa8   : > { %v404_v12 = vpop.trf.xlu1 }
  0xa9   : > { %v372_v13 = vpop.trf.xlu0  ;;  %425 = vst [vmem:[%s757_s26 + $0x48] sm:$0xff] %v404_v12 }
  0xaa   : > { %424 = vst [vmem:[%s757_s26 + $0x40] sm:$0xff] %v372_v13 }
  0xac   : > { %v405_v14 = vpop.trf.xlu1 }
  0xad   : > { %v373_v15 = vpop.trf.xlu0  ;;  %427 = vst [vmem:[%s757_s26 + $0x58] sm:$0xff] %v405_v14 }
  0xae   : > { %426 = vst [vmem:[%s757_s26 + $0x50] sm:$0xff] %v373_v15 }
  0xb0   : > { %v406_v16 = vpop.trf.xlu1 }
  0xb1   : > { %v374_v17 = vpop.trf.xlu0  ;;  %429 = vst [vmem:[%s757_s26 + $0x68] sm:$0xff] %v406_v16 }
  0xb2   : > { %428 = vst [vmem:[%s757_s26 + $0x60] sm:$0xff] %v374_v17 }
  0xb4   : > { %v407_v18 = vpop.trf.xlu1 }
  0xb5   : > { %v375_v19 = vpop.trf.xlu0  ;;  %431 = vst [vmem:[%s757_s26 + $0x78] sm:$0xff] %v407_v18 }
  0xb6   : > { %430 = vst [vmem:[%s757_s26 + $0x70] sm:$0xff] %v375_v19 }
  0xb8   : > { %v408_v20 = vpop.trf.xlu1 }
  0xb9   : > { %v376_v21 = vpop.trf.xlu0  ;;  %433 = vst [vmem:[%s757_s26 + $0x88] sm:$0xff] %v408_v20 }
  0xba   : > { %432 = vst [vmem:[%s757_s26 + $0x80] sm:$0xff] %v376_v21 }
  0xbc   : > { %v409_v22 = vpop.trf.xlu1 }
  0xbd   : > { %v377_v23 = vpop.trf.xlu0  ;;  %435 = vst [vmem:[%s757_s26 + $0x98] sm:$0xff] %v409_v22 }
  0xbe   : > { %434 = vst [vmem:[%s757_s26 + $0x90] sm:$0xff] %v377_v23 }
  0xc0   : > { %v410_v24 = vpop.trf.xlu1 }
  0xc1   : > { %v378_v25 = vpop.trf.xlu0  ;;  %437 = vst [vmem:[%s757_s26 + $0xa8] sm:$0xff] %v410_v24 }
  0xc2   : > { %436 = vst [vmem:[%s757_s26 + $0xa0] sm:$0xff] %v378_v25 }
  0xc4   : > { %v411_v26 = vpop.trf.xlu1 }
  0xc5   : > { %v379_v27 = vpop.trf.xlu0  ;;  %439 = vst [vmem:[%s757_s26 + $0xb8] sm:$0xff] %v411_v26 }
  0xc6   : > { %438 = vst [vmem:[%s757_s26 + $0xb0] sm:$0xff] %v379_v27 }
  0xc8   : > { %v412_v28 = vpop.trf.xlu1 }
  0xc9   : > { %v380_v29 = vpop.trf.xlu0  ;;  %441 = vst [vmem:[%s757_s26 + $0xc8] sm:$0xff] %v412_v28 }
  0xca   : > { %440 = vst [vmem:[%s757_s26 + $0xc0] sm:$0xff] %v380_v29 }
  0xcc   : > { %v413_v30 = vpop.trf.xlu1 }
  0xcd   : > { %v381_v31 = vpop.trf.xlu0  ;;  %443 = vst [vmem:[%s757_s26 + $0xd8] sm:$0xff] %v413_v30 }
  0xce   : > { %442 = vst [vmem:[%s757_s26 + $0xd0] sm:$0xff] %v381_v31 }
  0xd0   : > { %v414_v32 = vpop.trf.xlu1 }
  0xd1   : > { %v382_v33 = vpop.trf.xlu0  ;;  %445 = vst [vmem:[%s757_s26 + $0xe8] sm:$0xff] %v414_v32 }
  0xd2   : > { %444 = vst [vmem:[%s757_s26 + $0xe0] sm:$0xff] %v382_v33 }
  0xd4   : > { %v415_v34 = vpop.trf.xlu1 }
  0xd5   : > { %v383_v35 = vpop.trf.xlu0  ;;  %447 = vst [vmem:[%s757_s26 + $0xf8] sm:$0xff] %v415_v34 }
  0xd6   : > { %446 = vst [vmem:[%s757_s26 + $0xf0] sm:$0xff] %v383_v35 }
  0xd7 PF: > { %s13_s14 = sadd.s32 1, %s596_s14   ;;  %s804_s12 = smov %s592_s13 }
  0xd8   : > { %p10_p5 = scmp.ge.s32.totalorder %s13_s14, 4   ;;  %s805_s13 = smov %s807_s15 }
  0xda   :  { %12 = sbr.rel (!%p10_p5) target bundleno = 2 (0x2), region = 62 }

// kernel: conv_block_vggnet.2
= control target key start
LH: loop header
LB: loop body
LE: loop exit
PB: predicated region body
PF: predicated region fallthrough
CT: control target
= control target key end

     0   :  { %s4631_s12 = smov 0   ;;  %s4633_s13 = smov 0   ;;  %s5807_s0 = inlined_call_operand.vmem [shape: f32[2,18,18,8], index: 0, kind: input, shape index: {}]   ;;  %s5808_s1 = inlined_call_operand.vmem [shape: f32[9,8,128], index: 1, kind: input, shape index: {}]   ;;  %s5809_s2 = inlined_call_operand.vmem [shape: f32[2,256,128], index: 2, kind: output, shape index: {0}]   ;;  %s5810_s3 = inlined_call_operand.vmem [shape: f32[2,128], index: 3, kind: output, shape index: {1}]  }
   0x1   :  { %s4635_s14 = smov 0  }
   0x2 LB: > { %s23_s15 = sadd.s32 1, %s4604_s13  ;;  %p3258_p0 = scmp.ge.s32.totalorder %s4608_s14, 1  ;;  %s4608_s14 = sphi %s4635_s14, %s14_s14   ;;  %s4604_s13 = sphi %s4633_s13, %s5986_s13   ;;  %s4600_s12 = sphi %s4631_s12, %s5985_s12  }
   0x3   : > { %p24_p1 = scmp.ge.s32.totalorder %s23_s15, 2  ;;  %p163_p2 = scmp.lt.s32.totalorder %s4608_s14, 3 }
   0x5   : > { %s5988_s15 = smov (%p24_p1, %s23_s15), 0  ;;  %p164_p3 = pnand %p3258_p0, %p163_p2 }
   0x7   : > { %167 = sbr.rel (%p164_p3) target bundleno = 553 (0x229), region = 28 }
   0xe   : > { %p198_p4 = scmp.lt.s32.totalorder %s4600_s12, 1  ;;  %p3262_p5 = scmp.ne.s32.totalorder %s4600_s12, 0 }
   0xf   : > { %v4610_v0 = vmov (!%p3262_p5), 0.0  }
  0x10   : > { %s199_s16 = scalar_select %p198_p4, %s4600_s12, 1 }
  0x11   : > { %222 = sbr.rel (%p3262_p5) target bundleno = 24 (0x18), region = 32  ;;  %223 = vst [vmem:[%s5810_s3] sm:$0x3] (!%p3262_p5), %v4610_v0 }
  0x12   : > { %s4560_s17 = smul.u32 432, %s199_s16  ;;  %s3554_s18 = sshll.u32 %s199_s16, 8 }
  0x13   : > { %s4652_s21 = scalar_lea.vmem %s5809_s2, %s3554_s18 }
  0x14   : > { %s4657_s24 = scalar_lea.vmem %s5807_s0, %s4560_s17 }
  0x18 PF: > { %v279_v1 = vld [vmem:[%s5808_s1 + $0x8] sm:$0xff]  ;;  %v4668_v2 = vld [vmem:[%s5808_s1 + $0x20] sm:$0xff]  ;;  %vm335_vm0 = vcmask 1046528   ;;  %vm416_vm1 = vcmask 64512   ;;  %v4682_v7 = vld [vmem:[%s4657_s24 + $0x18] sm:$0xff]  ;;  %vm995_vm2 = vcmask 1045504  }
  0x19   : > { %v4671_v3 = vld [vmem:[%s4657_s24] sm:$0xff]  ;;  %3852 = vmatprep.subr.mxu1 %v279_v1  ;;  %4052 = vmatprep.subr.mxu0 %v4668_v2  ;;  %v4675_v4 = vld [vmem:[%s4657_s24 + $0x8] sm:$0xff]  ;;  %5884 = vst [vmem:[#allocation2_spill] sm:$0xff] %v4682_v7  ;;  %v341_v10 = vrot.slane %v4682_v7, 1  ;;  %v4694_v12 = vld [vmem:[%s4657_s24 + $0x10] sm:$0x3] }
  0x1a   : > { %v336_v5 = vrot.slane %v4671_v3, 1  ;;  %v278_v6 = vld [vmem:[%s5808_s1] sm:$0xff]  ;;  %3853 = vmatpush3.msra.mxu1 %v279_v1  ;;  %4053 = vmatpush3.msra.mxu0 %v4668_v2  ;;  %v337_v8 = vrot.slane %v4675_v4, 1  ;;  %v283_v11 = vld [vmem:[%s5808_s1 + $0x28] sm:$0xff]  ;;  %v339_v14 = vrot.slane %v4694_v12, 1  ;;  %v4702_v16 = vld [vmem:[%s4657_s24 + $0x30] sm:$0xff] }
  0x1b   : > { %v4687_v9 = vld [vmem:[%s4657_s24 + $0x20] sm:$0xff]  ;;  %3902 = vmatprep.subr.mxu1 %v278_v6  ;;  %4102 = vmatprep.subr.mxu0 %v283_v11  ;;  %v4699_v15 = vld [vmem:[%s4657_s24 + $0x28] sm:$0x3]  ;;  %v4707_v19 = vld [vmem:[%s4657_s24 + $0x38] sm:$0xff]  ;;  %v346_v20 = vrot.slane %v4702_v16, 1  ;;  %vm3128_vm3 = vcmask 1040384  }
  0x1c   : > { %5885 = vst [vmem:[#allocation3_spill] sm:$0xff] %v4687_v9  ;;  %v342_v13 = vrot.slane %v4687_v9, 1  ;;  %v338_v17 = vsel %vm335_vm0, %v336_v5, %v337_v8  ;;  %v344_v18 = vrot.slane %v4699_v15, 1  ;;  %v4711_v21 = vld [vmem:[%s4657_s24 + $0x40] sm:$0x3]  ;;  %v340_v23 = vsel %vm335_vm0, %v337_v8, %v339_v14  ;;  %v4719_v26 = vld [vmem:[%s4657_s24 + $0x48] sm:$0xff] }
  0x1d   : > { %3854 = vmatprep.mubr.msk.f32.mxu1 %vm416_vm1, %v338_v17  ;;  %v347_v24 = vrot.slane %v4707_v19, 1  ;;  %v349_v25 = vrot.slane %v4711_v21, 1  ;;  %v4722_v27 = vld [vmem:[%s4657_s24 + $0x50] sm:$0xff]  ;;  %v4725_v28 = vld [vmem:[%s4657_s24 + $0x58] sm:$0x3]  ;;  %v351_v30 = vrot.slane %v4719_v26, 1 }
  0x1e   : > { %v343_v22 = vsel %vm335_vm0, %v341_v10, %v342_v13  ;;  %3855 = vmatmul.mubr.msk.f32.vlgmr.msra.gmra.mrb[0].mxu1 %vm416_vm1, %v340_v23  ;;  %v345_v29 = vsel %vm335_vm0, %v342_v13, %v344_v18  ;;  %v352_v31 = vrot.slane %v4722_v27, 1  ;;  %v4733_v32 = vld [vmem:[%s4657_s24 + $0x60] sm:$0xff]  ;;  %v4736_v33 = vld [vmem:[%s4657_s24 + $0x68] sm:$0xff]  ;;  %v354_v36 = vrot.slane %v4725_v28, 1  ;;  %v4755_v40 = vld [vmem:[%s4657_s24 + $0x70] sm:$0x3] }
  0x1f   : > { %4054 = vmatprep.mubr.msk.f32.mxu0 %vm416_vm1, %v343_v22  ;;  %3903 = vmatpush3.msra.mxu1 %v278_v6  ;;  %v4740_v34 = vsel %vm335_vm0, %v346_v20, %v347_v24  ;;  %v4744_v35 = vsel %vm335_vm0, %v347_v24, %v349_v25  ;;  %v356_v38 = vrot.slane %v4733_v32, 1  ;;  %v357_v39 = vrot.slane %v4736_v33, 1  ;;  %v4759_v41 = vld [vmem:[%s4657_s24 + $0x78] sm:$0xff]  ;;  %v4762_v42 = vld [vmem:[%s4657_s24 + $0x80] sm:$0xff]  ;;  %v4771_v43 = vld [vmem:[%s5808_s1 + $0x30] sm:$0xff] }
  0x20   : > { %4055 = vmatmul.mubr.msk.f32.vlgmr.msra.gmra.mrb[0].mxu0 %vm416_vm1, %v345_v29  ;;  %5886 = vst [vmem:[#allocation4_spill] sm:$0xff] %v4740_v34  ;;  %3857 = vmatprep.mubr.msk.f32.mxu1 %vm416_vm1, %v343_v22  ;;  %5887 = vst [vmem:[#allocation5_spill] sm:$0xff] %v4744_v35  ;;  %v4750_v37 = vsel %vm335_vm0, %v351_v30, %v352_v31  ;;  %v4776_v44 = vsel %vm335_vm0, %v352_v31, %v354_v36  ;;  %v359_v45 = vrot.slane %v4755_v40, 1  ;;  %v4786_v49 = vld [vmem:[%s4657_s24 + $0x88] sm:$0x3]  ;;  %v4791_v50 = vld [vmem:[%s4657_s24 + $0x90] sm:$0xff] }
  0x21   : > { %4103 = vmatpush3.msra.mxu0 %v283_v11  ;;  %4057 = vmatprep.mubr.msk.f32.mxu0 %vm416_vm1, %v4740_v34  ;;  %5888 = vst [vmem:[#allocation6_spill] sm:$0xff] %v4750_v37  ;;  %5889 = vst [vmem:[#allocation7_spill] sm:$0xff] %v4776_v44  ;;  %v4781_v46 = vsel %vm335_vm0, %v356_v38, %v357_v39  ;;  %v361_v47 = vrot.slane %v4759_v41, 1  ;;  %v362_v48 = vrot.slane %v4762_v42, 1  ;;  %v4794_v51 = vld [vmem:[%s4657_s24 + $0x98] sm:$0xff]  ;;  %v364_v53 = vrot.slane %v4786_v49, 1 }
  0x22   : > { %3858 = vmatmul.mubr.msk.f32.gmra.mrb[2].mxu1 %vm416_vm1, %v345_v29  ;;  %4152 = vmatprep.subr.mxu0 %v4771_v43  ;;  %5890 = vst [vmem:[#allocation8_spill] sm:$0xff] %v4781_v46  ;;  %v4803_v52 = vsel %vm335_vm0, %v357_v39, %v359_v45  ;;  %v366_v55 = vrot.slane %v4791_v50, 1  ;;  %v367_v56 = vrot.slane %v4794_v51, 1  ;;  %v4812_v57 = vld [vmem:[%s4657_s24 + $0xa0] sm:$0x3]  ;;  %v4817_v58 = vld [vmem:[%s4657_s24 + $0xa8] sm:$0xff] }
  0x23   : > { %3860 = vmatprep.mubr.msk.f32.mxu1 %vm416_vm1, %v4740_v34  ;;  %5891 = vst [vmem:[#allocation9_spill] sm:$0xff] %v4803_v52  ;;  %v4807_v54 = vsel %vm335_vm0, %v361_v47, %v362_v48  ;;  %v4820_v59 = vld [vmem:[%s4657_s24 + $0xb0] sm:$0xff]  ;;  %v4829_v60 = vsel %vm335_vm0, %v362_v48, %v364_v53  ;;  %v369_v61 = vrot.slane %v4812_v57, 1  ;;  %v371_v0 = vrot.slane %v4817_v58, 1  ;;  %v4843_v5 = vld [vmem:[%s4657_s24 + $0xb8] sm:$0x3] }
  0x24   : > { %4058 = vmatmul.mubr.msk.f32.gmra.mrb[2].mxu0 %vm416_vm1, %v4744_v35  ;;  %5892 = vst [vmem:[#allocation10_spill] sm:$0xff] %v4807_v54  ;;  %5893 = vst [vmem:[#allocation11_spill] sm:$0xff] %v4829_v60  ;;  %v4835_v62 = vld [vmem:[%s5808_s1 + $0x10] sm:$0xff]  ;;  %v4838_v63 = vsel %vm335_vm0, %v366_v55, %v367_v56  ;;  %v372_v1 = vrot.slane %v4820_v59, 1  ;;  %v4849_v6 = vld [vmem:[%s4657_s24 + $0xc0] sm:$0xff]  ;;  %v374_v11 = vrot.slane %v4843_v5, 1 }
  0x25   : > { %4060 = vmatprep.mubr.msk.f32.mxu0 %vm416_vm1, %v4750_v37  ;;  %5894 = vst [vmem:[#allocation12_spill] sm:$0xff] %v4838_v63  ;;  %3952 = vmatprep.subr.mxu1 %v4835_v62  ;;  %v4852_v8 = vld [vmem:[%s4657_s24 + $0xc8] sm:$0xff]  ;;  %v4861_v10 = vsel %vm335_vm0, %v367_v56, %v369_v61  ;;  %v376_v14 = vrot.slane %v4849_v6, 1  ;;  %v4870_v18 = vld [vmem:[%s4657_s24 + $0xd0] sm:$0x3]  ;;  %v1001_v24 = vrot.slane %v4682_v7, 2 }
  0x26   : > { %3861 = vmatmul.mubr.msk.f32.gmra.mrb[4].mxu1 %vm416_vm1, %v4744_v35  ;;  %5895 = vst [vmem:[#allocation13_spill] sm:$0xff] %v4861_v10  ;;  %v4865_v13 = vsel %vm335_vm0, %v371_v0, %v372_v1  ;;  %v377_v17 = vrot.slane %v4852_v8, 1  ;;  %v4881_v20 = vsel %vm335_vm0, %v372_v1, %v374_v11  ;;  %v379_v22 = vrot.slane %v4870_v18, 1  ;;  %v4890_v29 = vld [vmem:[%s4657_s24 + $0xd8] sm:$0xff]  ;;  %v4893_v30 = vld [vmem:[%s4657_s24 + $0xe0] sm:$0xff]  ;;  %v4918_v53 = vld [vmem:[%s4657_s24 + $0xf0] sm:$0xff] }
  0x27   : > { %3863 = vmatprep.mubr.msk.f32.mxu1 %vm416_vm1, %v4750_v37  ;;  %5896 = vst [vmem:[#allocation14_spill] sm:$0xff] %v4865_v13  ;;  %5897 = vst [vmem:[#allocation15_spill] sm:$0xff] %v4881_v20  ;;  %v1002_v25 = vrot.slane %v4687_v9, 2  ;;  %v1004_v31 = vrot.slane %v4699_v15, 2  ;;  %v381_v38 = vrot.slane %v4890_v29, 1  ;;  %v382_v39 = vrot.slane %v4893_v30, 1 }
  0x28   : > { %4061 = vmatmul.mubr.msk.f32.gmra.mrb[4].mxu0 %vm416_vm1, %v4776_v44  ;;  %v4885_v23 = vsel %vm335_vm0, %v376_v14, %v377_v17  ;;  %v4905_v36 = vsel %vm335_vm0, %v377_v17, %v379_v22  ;;  %v4910_v45 = vld [vmem:[%s4657_s24 + $0xe8] sm:$0x3]  ;;  %v1006_v48 = vrot.slane %v4702_v16, 2  ;;  %v1007_v15 = vrot.slane %v4707_v19, 2  ;;  %v4921_v55 = vld [vmem:[%s4657_s24 + $0xf8] sm:$0xff] }
  0x29   : > { %4063 = vmatprep.mubr.msk.f32.mxu0 %vm416_vm1, %v4781_v46  ;;  %5898 = vst [vmem:[#allocation16_spill] sm:$0xff] %v4885_v23  ;;  %5899 = vst [vmem:[#allocation17_spill] sm:$0xff] %v4905_v36  ;;  %v4913_v47 = vsel %vm995_vm2, %v1001_v24, %v1002_v25  ;;  %v384_v56 = vrot.slane %v4910_v45, 1  ;;  %v1009_v61 = vrot.slane %v4711_v21, 2  ;;  %v4934_v0 = vsel %vm995_vm2, %v1002_v25, %v1004_v31  ;;  %v4942_v17 = vld [vmem:[%s4657_s24 + $0x100] sm:$0x3] }
  0x2a   : > { %3864 = vmatmul.mubr.msk.f32.gmra.mrb[6].mxu1 %vm416_vm1, %v4776_v44  ;;  %v4937_v1 = vsel %vm335_vm0, %v381_v38, %v382_v39  ;;  %v386_v11 = vrot.slane %v4918_v53, 1  ;;  %v387_v14 = vrot.slane %v4921_v55, 1  ;;  %v4945_v22 = vsel %vm995_vm2, %v1006_v48, %v1007_v15  ;;  %v4953_v25 = vld [vmem:[%s4657_s24 + $0x110] sm:$0xff]  ;;  %v4960_v31 = vld [vmem:[%s5808_s1 + $0x38] sm:$0xff]  ;;  %v5054_v35 = vld [vmem:[%s4657_s24 + $0x148] sm:$0x3] }
  0x2b   : > { %3866 = vmatprep.mubr.msk.f32.mxu1 %vm416_vm1, %v4781_v46  ;;  %5900 = vst [vmem:[#allocation18_spill] sm:$0xff] %v4937_v1  ;;  %v1011_v21 = vrot.slane %v4719_v26, 2  ;;  %v1012_v24 = vrot.slane %v4722_v27, 2  ;;  %v4967_v38 = vsel %vm335_vm0, %v382_v39, %v384_v56  ;;  %v4970_v48 = vsel %vm995_vm2, %v1007_v15, %v1009_v61  ;;  %v4983_v56 = vld [vmem:[%s4657_s24 + $0x118] sm:$0x3] }
  0x2c   : > { %4064 = vmatmul.mubr.msk.f32.gmra.mrb[6].mxu0 %vm416_vm1, %v4803_v52  ;;  %5901 = vst [vmem:[#allocation19_spill] sm:$0xff] %v4967_v38  ;;  %5902 = vst [vmem:[#allocation20_spill] sm:$0xff] %v4970_v48  ;;  %v392_v39 = vrot.slane %v4953_v25, 1  ;;  %v1016_v61 = vrot.slane %v4733_v32, 2  ;;  %v5027_v46 = vld [vmem:[%s4657_s24 + $0x138] sm:$0xff]  ;;  %v1024_v44 = vrot.slane %v4786_v49, 2 }
  0x2d   : > { %4066 = vmatprep.mubr.msk.f32.mxu0 %vm416_vm1, %v4807_v54  ;;  %v4986_v15 = vsel %vm995_vm2, %v1011_v21, %v1012_v24  ;;  %v394_v21 = vrot.slane %v4983_v56, 1  ;;  %v401_v37 = vrot.slane %v5027_v46, 1  ;;  %v1029_v34 = vrot.slane %v4812_v57, 2 }
  0x2e   : > { %3867 = vmatmul.mubr.msk.f32.gmra.mrb[8].mxu1 %vm416_vm1, %v4803_v52  ;;  %5904 = vst [vmem:[#allocation22_spill] sm:$0xff] %v4986_v15  ;;  %v5019_v52 = vld [vmem:[%s4657_s24 + $0x130] sm:$0x3]  ;;  %v1031_v57 = vrot.slane %v4817_v58, 2 }
  0x2f   : > { %3869 = vmatprep.mubr.msk.f32.mxu1 %vm416_vm1, %v4807_v54 }
  0x30   : > { %4067 = vmatmul.mubr.msk.f32.gmra.mrb[8].mxu0 %vm416_vm1, %v4829_v60 }
  0x31   : > { %4069 = vmatprep.mubr.msk.f32.mxu0 %vm416_vm1, %v4838_v63 }
  0x32   : > { %3870 = vmatmul.mubr.msk.f32.gmra.mrb[10].mxu1 %vm416_vm1, %v4829_v60 }
  0x33   : > { %3872 = vmatprep.mubr.msk.f32.mxu1 %vm416_vm1, %v4838_v63  ;;  %v1019_v63 = vrot.slane %v4755_v40, 2  ;;  %v1021_v40 = vrot.slane %v4759_v41, 2 }
  0x34   : > { %4070 = vmatmul.mubr.msk.f32.gmra.mrb[10].mxu0 %vm416_vm1, %v4861_v10 }
  0x35   : > { %4072 = vmatprep.mubr.msk.f32.mxu0 %vm416_vm1, %v4865_v13 }
  0x36   : > { %3873 = vmatmul.mubr.msk.f32.gmra.mrb[12].mxu1 %vm416_vm1, %v4861_v10  ;;  %v4991_v10 = vld [vmem:[%s4657_s24 + $0x120] sm:$0xff] }
  0x37   : > { %3875 = vmatprep.mubr.msk.f32.mxu1 %vm416_vm1, %v4865_v13  ;;  %v1014_v13 = vrot.slane %v4725_v28, 2  ;;  %v396_v54 = vrot.slane %v4991_v10, 1 }
  0x38   : > { %4073 = vmatmul.mubr.msk.f32.gmra.mrb[12].mxu0 %vm416_vm1, %v4881_v20 }
  0x39   : > { %4075 = vmatprep.mubr.msk.f32.mxu0 %vm416_vm1, %v4885_v23  ;;  %v5011_v60 = vsel %vm995_vm2, %v1012_v24, %v1014_v13  ;;  %v5030_v13 = vld [vmem:[%s4657_s24 + $0x140] sm:$0xff] }
  0x3a   : > { %3876 = vmatmul.mubr.msk.f32.gmra.mrb[14].mxu1 %vm416_vm1, %v4881_v20  ;;  %v4977_v20 = vsel %vm335_vm0, %v386_v11, %v387_v14  ;;  %v4994_v11 = vld [vmem:[%s4657_s24 + $0x128] sm:$0xff]  ;;  %5906 = vst [vmem:[#allocation24_spill] sm:$0xff] %v5011_v60 }
  0x3b   : > { %3878 = vmatprep.mubr.msk.f32.mxu1 %vm416_vm1, %v4885_v23  ;;  %v4950_v23 = vld [vmem:[%s4657_s24 + $0x108] sm:$0xff]  ;;  %5903 = vst [vmem:[#allocation21_spill] sm:$0xff] %v4977_v20 }
  0x3c   : > { %4076 = vmatmul.mubr.msk.f32.gmra.mrb[14].mxu0 %vm416_vm1, %v4905_v36 }
  0x3d   : > { %4104 = vmatprep.mubr.msk.f32.mxu0 %vm416_vm1, %v4913_v47 }
  0x3e   : > { %3879 = vmatmul.mubr.msk.f32.gmra.mrb[16].mxu1 %vm416_vm1, %v4905_v36  ;;  %v389_v36 = vrot.slane %v4942_v17, 1 }
  0x3f   : > { %3881 = vmatprep.mubr.msk.f32.mxu1 %vm416_vm1, %v4937_v1  ;;  %v391_v1 = vrot.slane %v4950_v23, 1 }
  0x40   : > { %4105 = vmatmul.mubr.msk.f32.vlgmr.msra.gmra.mrb[0].mxu0 %vm416_vm1, %v4934_v0  ;;  %v5004_v28 = vsel %vm335_vm0, %v387_v14, %v389_v36  ;;  %v1022_v14 = vrot.slane %v4762_v42, 2 }
  0x41   : > { %4153 = vmatpush3.msra.mxu0 %v4771_v43  ;;  %4107 = vmatprep.mubr.msk.f32.mxu0 %vm416_vm1, %v4945_v22  ;;  %v1017_v43 = vrot.slane %v4736_v33, 2  ;;  %5905 = vst [vmem:[#allocation23_spill] sm:$0xff] %v5004_v28 }
  0x42   : > { %4202 = vmatprep.subr.mxu0 %v4960_v31  ;;  %3882 = vmatmul.mubr.msk.f32.gmra.mrb[18].mxu1 %vm416_vm1, %v4967_v38  ;;  %v5014_v38 = vsel %vm335_vm0, %v391_v1, %v392_v39  ;;  %v5039_v1 = vsel %vm335_vm0, %v392_v39, %v394_v21  ;;  %v5057_v39 = vsel %vm995_vm2, %v1021_v40, %v1022_v14  ;;  %v5062_v21 = vld [vmem:[%s4657_s24 + $0x150] sm:$0xff]  ;;  %v404_v40 = vrot.slane %v5054_v35, 1 }
  0x43   : > { %3884 = vmatprep.mubr.msk.f32.mxu1 %vm416_vm1, %v4977_v20  ;;  %5907 = vst [vmem:[#allocation25_spill] sm:$0xff] %v5014_v38  ;;  %v397_v20 = vrot.slane %v4994_v11, 1  ;;  %v5022_v36 = vsel %vm995_vm2, %v1016_v61, %v1017_v43  ;;  %5909 = vst [vmem:[#allocation27_spill] sm:$0xff] %v5039_v1  ;;  %v5042_v24 = vsel %vm995_vm2, %v1017_v43, %v1019_v63  ;;  %v399_v61 = vrot.slane %v5019_v52, 1 }
  0x44   : > { %4108 = vmatmul.mubr.msk.f32.gmra.mrb[2].mxu0 %vm416_vm1, %v4970_v48  ;;  %5908 = vst [vmem:[#allocation26_spill] sm:$0xff] %v5022_v36  ;;  %5910 = vst [vmem:[#allocation28_spill] sm:$0xff] %v5042_v24  ;;  %v1026_v63 = vrot.slane %v4791_v50, 2  ;;  %v1027_v43 = vrot.slane %v4794_v51, 2  ;;  %v5124_v48 = vld [vmem:[%s4657_s24 + $0x178] sm:$0x3] }
  0x45   : > { %4110 = vmatprep.mubr.msk.f32.mxu0 %vm416_vm1, %v4986_v15  ;;  %5912 = vst [vmem:[#allocation30_spill] sm:$0xff] %v5057_v39  ;;  %v5074_v49 = vsel %vm335_vm0, %v397_v20, %v399_v61  ;;  %v1032_v61 = vrot.slane %v4820_v59, 2 }
  0x46   : > { %3885 = vmatmul.mubr.msk.f32.gmra.mrb[20].mxu1 %vm416_vm1, %v5004_v28  ;;  %v5048_v28 = vsel %vm335_vm0, %v396_v54, %v397_v20  ;;  %v5065_v54 = vld [vmem:[%s4657_s24 + $0x158] sm:$0xff]  ;;  %5913 = vst [vmem:[#allocation31_spill] sm:$0xff] %v5074_v49  ;;  %v5092_v20 = vsel %vm995_vm2, %v1026_v63, %v1027_v43 }
  0x47   : > { %3887 = vmatprep.mubr.msk.f32.mxu1 %vm416_vm1, %v5014_v38  ;;  %5911 = vst [vmem:[#allocation29_spill] sm:$0xff] %v5048_v28  ;;  %v402_v38 = vrot.slane %v5030_v13, 1 }
  0x48   : > { %4111 = vmatmul.mubr.msk.f32.gmra.mrb[4].mxu0 %vm416_vm1, %v5011_v60  ;;  %v5089_v60 = vld [vmem:[%s4657_s24 + $0x160] sm:$0x3] }
  0x49   : > { %4113 = vmatprep.mubr.msk.f32.mxu0 %vm416_vm1, %v5022_v36  ;;  %v5081_v36 = vsel %vm995_vm2, %v1022_v14, %v1024_v44  ;;  %v5100_v44 = vld [vmem:[%s4657_s24 + $0x170] sm:$0xff]  ;;  %v5112_v14 = vsel %vm995_vm2, %v1027_v43, %v1029_v34  ;;  %v409_v63 = vrot.slane %v5089_v60, 1  ;;  %v1036_v34 = vrot.slane %v4849_v6, 2 }
  0x4a   : > { %3888 = vmatmul.mubr.msk.f32.gmra.mrb[22].mxu1 %vm416_vm1, %v5039_v1  ;;  %5914 = vst [vmem:[#allocation32_spill] sm:$0xff] %v5081_v36  ;;  %v5084_v1 = vsel %vm335_vm0, %v401_v37, %v402_v38  ;;  %5916 = vst [vmem:[#allocation34_spill] sm:$0xff] %v5100_v44  ;;  %v5109_v37 = vsel %vm335_vm0, %v402_v38, %v404_v40  ;;  %v5127_v38 = vsel %vm995_vm2, %v1031_v57, %v1032_v61 }
  0x4b   : > { %3890 = vmatprep.mubr.msk.f32.mxu1 %vm416_vm1, %v5048_v28  ;;  %5915 = vst [vmem:[#allocation33_spill] sm:$0xff] %v5084_v1  ;;  %v407_v28 = vrot.slane %v5065_v54, 1  ;;  %5917 = vst [vmem:[#allocation35_spill] sm:$0xff] %v5109_v37  ;;  %v1037_v43 = vrot.slane %v4852_v8, 2 }
  0x4c   : > { %4114 = vmatmul.mubr.msk.f32.gmra.mrb[6].mxu0 %vm416_vm1, %v5042_v24  ;;  %v406_v24 = vrot.slane %v5062_v21, 1  ;;  %5918 = vst [vmem:[#allocation36_spill] sm:$0xff] %v5112_v14 }
  0x4d   : > { %4116 = vmatprep.mubr.msk.f32.mxu0 %vm416_vm1, %v5057_v39  ;;  %v5097_v39 = vld [vmem:[%s4657_s24 + $0x168] sm:$0xff] }
  0x4e   : > { %3891 = vmatmul.mubr.msk.f32.gmra.mrb[24].mxu1 %vm416_vm1, %v5074_v49  ;;  %v5118_v15 = vsel %vm335_vm0, %v406_v24, %v407_v28  ;;  %v1034_v49 = vrot.slane %v4843_v5, 2  ;;  %v5138_v5 = vsel %vm335_vm0, %v407_v28, %v409_v63  ;;  %v414_v24 = vrot.slane %v5124_v48, 1 }
  0x4f   : > { %3893 = vmatprep.mubr.msk.f32.mxu1 %vm416_vm1, %v5084_v1  ;;  %5919 = vst [vmem:[#allocation37_spill] sm:$0xff] %v5118_v15  ;;  %v412_v1 = vrot.slane %v5100_v44, 1  ;;  %5920 = vst [vmem:[#allocation38_spill] sm:$0xff] %v5138_v5  ;;  %v1042_v28 = vrot.slane %v4893_v30, 2  ;;  %v1046_v63 = vrot.slane %v4918_v53, 2 }
  0x50   : > { %4117 = vmatmul.mubr.msk.f32.gmra.mrb[8].mxu0 %vm416_vm1, %v5081_v36  ;;  %v411_v36 = vrot.slane %v5097_v39, 1  ;;  %v5144_v40 = vsel %vm995_vm2, %v1032_v61, %v1034_v49  ;;  %v1044_v49 = vrot.slane %v4910_v45, 2 }
  0x51   : > { %4119 = vmatprep.mubr.msk.f32.mxu0 %vm416_vm1, %v5092_v20 }
  0x52   : > { %3894 = vmatmul.mubr.msk.f32.gmra.mrb[26].mxu1 %vm416_vm1, %v5109_v37  ;;  %v5147_v57 = vsel %vm335_vm0, %v411_v36, %v412_v1  ;;  %v1039_v37 = vrot.slane %v4870_v18, 2  ;;  %v5162_v36 = vsel %vm335_vm0, %v412_v1, %v414_v24  ;;  %v5184_v45 = vsel %vm995_vm2, %v1042_v28, %v1044_v49  ;;  %v5197_v24 = vld [vmem:[%s5808_s1 + $0x18] sm:$0xff] }
  0x53   : > { %3896 = vmatprep.mubr.msk.f32.mxu1 %vm416_vm1, %v5118_v15  ;;  %5921 = vst [vmem:[#allocation39_spill] sm:$0xff] %v5147_v57  ;;  %v1041_v15 = vrot.slane %v4890_v29, 2  ;;  %5922 = vst [vmem:[#allocation40_spill] sm:$0xff] %v5162_v36 }
  0x54   : > { %4120 = vmatmul.mubr.msk.f32.gmra.mrb[10].mxu0 %vm416_vm1, %v5112_v14  ;;  %v5151_v14 = vsel %vm995_vm2, %v1036_v34, %v1037_v43  ;;  %v5167_v18 = vsel %vm995_vm2, %v1037_v43, %v1039_v37  ;;  %v1047_v34 = vrot.slane %v4921_v55, 2  ;;  %v1051_v37 = vrot.slane %v4950_v23, 2 }
  0x55   : > { %4122 = vmatprep.mubr.msk.f32.mxu0 %vm416_vm1, %v5127_v38  ;;  %v5171_v61 = vsel %vm995_vm2, %v1041_v15, %v1042_v28  ;;  %v1049_v15 = vrot.slane %v4942_v17, 2  ;;  %v1052_v43 = vrot.slane %v4953_v25, 2  ;;  %v1054_v28 = vrot.slane %v4983_v56, 2 }
  0x56   : > { %3897 = vmatmul.mubr.msk.f32.gmra.mrb[28].mxu1 %vm416_vm1, %v5138_v5  ;;  %v5188_v1 = vsel %vm995_vm2, %v1046_v63, %v1047_v34  ;;  %v1056_v63 = vrot.slane %v4991_v10, 2  ;;  %v1072_v5 = vrot.slane %v5100_v44, 2 }
  0x57   : > { %3899 = vmatprep.mubr.msk.f32.mxu1 %vm416_vm1, %v5147_v57  ;;  %v5207_v17 = vsel %vm995_vm2, %v1047_v34, %v1049_v15  ;;  %v5211_v49 = vsel %vm995_vm2, %v1051_v37, %v1052_v43  ;;  %v5225_v56 = vsel %vm995_vm2, %v1052_v43, %v1054_v28  ;;  %v1059_v34 = vrot.slane %v5019_v52, 2 }
  0x58   : > { %4123 = vmatmul.mubr.msk.f32.gmra.mrb[12].mxu0 %vm416_vm1, %v5144_v40  ;;  %5923 = vst [vmem:[#allocation41_spill] sm:$0xff] %v5211_v49  ;;  %v1061_v37 = vrot.slane %v5027_v46, 2  ;;  %v1064_v43 = vrot.slane %v5054_v35, 2  ;;  %v1067_v57 = vrot.slane %v5065_v54, 2 }
  0x59   : > { %4125 = vmatprep.mubr.msk.f32.mxu0 %vm416_vm1, %v5151_v14 }
  0x5a   : > { %3900 = vmatmul.mubr.msk.f32.gmra.mrb[30].mxu1 %vm416_vm1, %v5162_v36  ;;  %v1062_v36 = vrot.slane %v5030_v13, 2 }
  0x5b   : > { %3904 = vmatprep.mubr.msk.f32.mxu1 %vm416_vm1, %v4671_v3 }
  0x5c   : > { %4126 = vmatmul.mubr.msk.f32.gmra.mrb[14].mxu0 %vm416_vm1, %v5167_v18  ;;  %v5246_v28 = vsel %vm995_vm2, %v1061_v37, %v1062_v36  ;;  %v5259_v35 = vsel %vm995_vm2, %v1062_v36, %v1064_v43  ;;  %v1071_v37 = vrot.slane %v5097_v39, 2  ;;  %v1074_v36 = vrot.slane %v5124_v48, 2 }
  0x5d   : > { %4128 = vmatprep.mubr.msk.f32.mxu0 %vm416_vm1, %v5171_v61  ;;  %5925 = vst [vmem:[#allocation43_spill] sm:$0xff] %v5246_v28  ;;  %5926 = vst [vmem:[#allocation44_spill] sm:$0xff] %v5259_v35 }
  0x5e   : > { %3905 = vmatmul.mubr.msk.f32.vlgmr.msra.gmra.mrb[0].mxu1 %vm416_vm1, %v4675_v4  ;;  %v5286_v43 = vsel %vm995_vm2, %v1071_v37, %v1072_v5  ;;  %v5302_v48 = vsel %vm995_vm2, %v1072_v5, %v1074_v36  ;;  %v997_v37 = vrot.slane %v4675_v4, 2  ;;  %v999_v36 = vrot.slane %v4694_v12, 2  ;;  %v5933_v4 = vld [vmem:[#allocation20_spill] sm:$0xff]  ;;  %v5934_v12 = vld [vmem:[#allocation22_spill] sm:$0xff] }
  0x5f   : > { %3953 = vmatpush3.msra.mxu1 %v4835_v62  ;;  %3907 = vmatprep.mubr.msk.f32.mxu1 %vm416_vm1, %v4682_v7  ;;  %v1057_v62 = vrot.slane %v4994_v11, 2  ;;  %v5273_v7 = vld [vmem:[%s4657_s24 + $0x188] sm:$0xff]  ;;  %5929 = vst [vmem:[#allocation47_spill] sm:$0xff] %v5286_v43  ;;  %5930 = vst [vmem:[#allocation48_spill] sm:$0xff] %v5302_v48 }
  0x60   : > { %4129 = vmatmul.mubr.msk.f32.gmra.mrb[16].mxu0 %vm416_vm1, %v5184_v45  ;;  %4002 = vmatprep.subr.mxu1 %v5197_v24 }
  0x61   : > { %4131 = vmatprep.mubr.msk.f32.mxu0 %vm416_vm1, %v5188_v1  ;;  %v5229_v15 = vsel %vm995_vm2, %v1056_v63, %v1057_v62  ;;  %v5242_v52 = vsel %vm995_vm2, %v1057_v62, %v1059_v34  ;;  %v1066_v63 = vrot.slane %v5062_v21, 2  ;;  %v1069_v62 = vrot.slane %v5089_v60, 2 }
  0x62   : > { %3908 = vmatmul.mubr.msk.f32.gmra.mrb[2].mxu1 %vm416_vm1, %v4687_v9  ;;  %5924 = vst [vmem:[#allocation42_spill] sm:$0xff] %v5242_v52  ;;  %v5270_v9 = vld [vmem:[%s4657_s24 + $0x180] sm:$0xff] }
  0x63   : > { %3910 = vmatprep.mubr.msk.f32.mxu1 %vm416_vm1, %v4702_v16  ;;  %v5263_v34 = vsel %vm995_vm2, %v1066_v63, %v1067_v57  ;;  %v5282_v60 = vsel %vm995_vm2, %v1067_v57, %v1069_v62  ;;  %v1927_v63 = vrot.slane %v5270_v9, 2 }
  0x64   : > { %4132 = vmatmul.mubr.msk.f32.gmra.mrb[18].mxu0 %vm416_vm1, %v5207_v17  ;;  %5927 = vst [vmem:[#allocation45_spill] sm:$0xff] %v5263_v34  ;;  %5928 = vst [vmem:[#allocation46_spill] sm:$0xff] %v5282_v60 }
  0x65   : > { %4134 = vmatprep.mubr.msk.f32.mxu0 %vm416_vm1, %v5211_v49 }
  0x66   : > { %3911 = vmatmul.mubr.msk.f32.gmra.mrb[4].mxu1 %vm416_vm1, %v4707_v19 }
  0x67   : > { %3913 = vmatprep.mubr.msk.f32.mxu1 %vm416_vm1, %v4719_v26 }
  0x68   : > { %4135 = vmatmul.mubr.msk.f32.gmra.mrb[20].mxu0 %vm416_vm1, %v5225_v56 }
  0x69   : > { %4137 = vmatprep.mubr.msk.f32.mxu0 %vm416_vm1, %v5229_v15 }
  0x6a   : > { %3914 = vmatmul.mubr.msk.f32.gmra.mrb[6].mxu1 %vm416_vm1, %v4722_v27 }
  0x6b   : > { %3916 = vmatprep.mubr.msk.f32.mxu1 %vm416_vm1, %v4733_v32 }
  0x6c   : > { %4138 = vmatmul.mubr.msk.f32.gmra.mrb[22].mxu0 %vm416_vm1, %v5242_v52  ;;  %v5291_v52 = vld [vmem:[%s4657_s24 + $0x190] sm:$0x3] }
  0x6d   : > { %4140 = vmatprep.mubr.msk.f32.mxu0 %vm416_vm1, %v5246_v28  ;;  %v1928_v28 = vrot.slane %v5273_v7, 2  ;;  %v1930_v57 = vrot.slane %v5291_v52, 2 }
  0x6e   : > { %3917 = vmatmul.mubr.msk.f32.gmra.mrb[8].mxu1 %vm416_vm1, %v4736_v33 }
  0x6f   : > { %3919 = vmatprep.mubr.msk.f32.mxu1 %vm416_vm1, %v4759_v41  ;;  %v5306_v62 = vsel %vm995_vm2, %v1927_v63, %v1928_v28  ;;  %v5317_v5 = vsel %vm995_vm2, %v1928_v28, %v1930_v57  ;;  %v5332_v28 = vld [vmem:[%s5808_s1 + $0x40] sm:$0xff] }
  0x70   : > { %4141 = vmatmul.mubr.msk.f32.gmra.mrb[24].mxu0 %vm416_vm1, %v5259_v35  ;;  %5931 = vst [vmem:[#allocation49_spill] sm:$0xff] %v5306_v62  ;;  %5932 = vst [vmem:[#allocation50_spill] sm:$0xff] %v5317_v5  ;;  %v5938_v57 = vld [vmem:[#allocation30_spill] sm:$0xff] }
  0x71   : > { %4143 = vmatprep.mubr.msk.f32.mxu0 %vm416_vm1, %v5263_v34 }
  0x72   : > { %3920 = vmatmul.mubr.msk.f32.gmra.mrb[10].mxu1 %vm416_vm1, %v4762_v42 }
  0x73   : > { %3922 = vmatprep.mubr.msk.f32.mxu1 %vm416_vm1, %v4791_v50 }
  0x74   : > { %4144 = vmatmul.mubr.msk.f32.gmra.mrb[26].mxu0 %vm416_vm1, %v5282_v60 }
  0x75   : > { %4146 = vmatprep.mubr.msk.f32.mxu0 %vm416_vm1, %v5286_v43 }
  0x76   : > { %3923 = vmatmul.mubr.msk.f32.gmra.mrb[12].mxu1 %vm416_vm1, %v4794_v51 }
  0x77   : > { %3925 = vmatprep.mubr.msk.f32.mxu1 %vm416_vm1, %v4817_v58 }
  0x78   : > { %4147 = vmatmul.mubr.msk.f32.gmra.mrb[28].mxu0 %vm416_vm1, %v5302_v48 }
  0x79   : > { %4149 = vmatprep.mubr.msk.f32.mxu0 %vm416_vm1, %v5306_v62  ;;  %v5943_v62 = vld [vmem:[#allocation6_spill] sm:$0xff] }
  0x7a   : > { %3926 = vmatmul.mubr.msk.f32.gmra.mrb[14].mxu1 %vm416_vm1, %v4820_v59 }
  0x7b   : > { %3928 = vmatprep.mubr.msk.f32.mxu1 %vm416_vm1, %v4849_v6 }
  0x7c   : > { %4150 = vmatmul.mubr.msk.f32.gmra.mrb[30].mxu0 %vm416_vm1, %v5317_v5  ;;  %v5942_v5 = vld [vmem:[#allocation5_spill] sm:$0xff] }
  0x7d   : > { %4154 = vmatprep.mubr.msk.f32.mxu0 %vm416_vm1, %v4702_v16 }
  0x7e   : > { %3929 = vmatmul.mubr.msk.f32.gmra.mrb[16].mxu1 %vm416_vm1, %v4852_v8 }
  0x7f   : > { %3931 = vmatprep.mubr.msk.f32.mxu1 %vm416_vm1, %v4890_v29 }
  0x80   : > { %4155 = vmatmul.mubr.msk.f32.vlgmr.msra.gmra.mrb[0].mxu0 %vm416_vm1, %v4707_v19 }
  0x81   : > { %4203 = vmatpush3.msra.mxu0 %v4960_v31  ;;  %4157 = vmatprep.mubr.msk.f32.mxu0 %vm416_vm1, %v4719_v26  ;;  %v996_v31 = vrot.slane %v4671_v3, 2  ;;  %v1000_v3 = vsel %vm995_vm2, %v997_v37, %v999_v36  ;;  %v5940_v36 = vld [vmem:[#allocation36_spill] sm:$0xff] }
  0x82   : > { %4252 = vmatprep.subr.mxu0 %v5332_v28  ;;  %3932 = vmatmul.mubr.msk.f32.gmra.mrb[18].mxu1 %vm416_vm1, %v4893_v30 }
  0x83   : > { %3934 = vmatprep.mubr.msk.f32.mxu1 %vm416_vm1, %v4918_v53  ;;  %v998_v63 = vsel %vm995_vm2, %v996_v31, %v997_v37  ;;  %v5939_v31 = vld [vmem:[#allocation32_spill] sm:$0xff]  ;;  %v5452_v37 = vld [vmem:[%s4657_s24 + $0x198] sm:$0xff] }
  0x84   : > { %4158 = vmatmul.mubr.msk.f32.gmra.mrb[2].mxu0 %vm416_vm1, %v4722_v27 }
  0x85   : > { %4160 = vmatprep.mubr.msk.f32.mxu0 %vm416_vm1, %v4733_v32 }
  0x86   : > { %3935 = vmatmul.mubr.msk.f32.gmra.mrb[20].mxu1 %vm416_vm1, %v4921_v55 }
  0x87   : > { %3937 = vmatprep.mubr.msk.f32.mxu1 %vm416_vm1, %v4950_v23 }
  0x88   : > { %4161 = vmatmul.mubr.msk.f32.gmra.mrb[4].mxu0 %vm416_vm1, %v4736_v33 }
  0x89   : > { %4163 = vmatprep.mubr.msk.f32.mxu0 %vm416_vm1, %v4759_v41 }
  0x8a   : > { %3938 = vmatmul.mubr.msk.f32.gmra.mrb[22].mxu1 %vm416_vm1, %v4953_v25 }
  0x8b   : > { %3940 = vmatprep.mubr.msk.f32.mxu1 %vm416_vm1, %v4991_v10 }
  0x8c   : > { %4164 = vmatmul.mubr.msk.f32.gmra.mrb[6].mxu0 %vm416_vm1, %v4762_v42 }
  0x8d   : > { %4166 = vmatprep.mubr.msk.f32.mxu0 %vm416_vm1, %v4791_v50 }
  0x8e   : > { %3941 = vmatmul.mubr.msk.f32.gmra.mrb[24].mxu1 %vm416_vm1, %v4994_v11 }
  0x8f   : > { %3943 = vmatprep.mubr.msk.f32.mxu1 %vm416_vm1, %v5027_v46 }
  0x90   : > { %4167 = vmatmul.mubr.msk.f32.gmra.mrb[8].mxu0 %vm416_vm1, %v4794_v51 }
  0x91   : > { %4169 = vmatprep.mubr.msk.f32.mxu0 %vm416_vm1, %v4817_v58 }
  0x92   : > { %3944 = vmatmul.mubr.msk.f32.gmra.mrb[26].mxu1 %vm416_vm1, %v5030_v13 }
  0x93   : > { %3946 = vmatprep.mubr.msk.f32.mxu1 %vm416_vm1, %v5062_v21 }
  0x94   : > { %4170 = vmatmul.mubr.msk.f32.gmra.mrb[10].mxu0 %vm416_vm1, %v4820_v59 }
  0x95   : > { %4172 = vmatprep.mubr.msk.f32.mxu0 %vm416_vm1, %v4849_v6 }
  0x96   : > { %3947 = vmatmul.mubr.msk.f32.gmra.mrb[28].mxu1 %vm416_vm1, %v5065_v54 }
  0x97   : > { %3949 = vmatprep.mubr.msk.f32.mxu1 %vm416_vm1, %v5097_v39 }
  0x98   : > { %4173 = vmatmul.mubr.msk.f32.gmra.mrb[12].mxu0 %vm416_vm1, %v4852_v8 }
  0x99   : > { %4175 = vmatprep.mubr.msk.f32.mxu0 %vm416_vm1, %v4890_v29 }
  0x9a   : > { %3950 = vmatmul.mubr.msk.f32.gmra.mrb[30].mxu1 %vm416_vm1, %v5100_v44 }
  0x9b   : > { %3954 = vmatprep.mubr.msk.f32.mxu1 %vm416_vm1, %v998_v63  ;;  %v5463_v63 = vld [vmem:[%s4657_s24 + $0x1a0] sm:$0xff] }
  0x9c   : > { %4176 = vmatmul.mubr.msk.f32.gmra.mrb[14].mxu0 %vm416_vm1, %v4893_v30 }
  0x9d   : > { %4178 = vmatprep.mubr.msk.f32.mxu0 %vm416_vm1, %v4918_v53 }
  0x9e   : > { %3955 = vmatmul.mubr.msk.f32.vlgmr.msra.gmra.mrb[0].mxu1 %vm416_vm1, %v1000_v3  ;;  %v5941_v3 = vld [vmem:[#allocation4_spill] sm:$0xff] }
  0x9f   : > { %4003 = vmatpush3.msra.mxu1 %v5197_v24  ;;  %3957 = vmatprep.mubr.msk.f32.mxu1 %vm416_vm1, %v4913_v47  ;;  %v5935_v47 = vld [vmem:[#allocation24_spill] sm:$0xff] }
  0xa0   : > { %4179 = vmatmul.mubr.msk.f32.gmra.mrb[16].mxu0 %vm416_vm1, %v4921_v55  ;;  %4302 = vmatprep.subr.mxu1 %v4668_v2  ;;  %v5937_v24 = vld [vmem:[#allocation28_spill] sm:$0xff] }
  0xa1   : > { %4181 = vmatprep.mubr.msk.f32.mxu0 %vm416_vm1, %v4950_v23 }
  0xa2   : > { %3958 = vmatmul.mubr.msk.f32.gmra.mrb[2].mxu1 %vm416_vm1, %v4934_v0  ;;  %v5936_v0 = vld [vmem:[#allocation26_spill] sm:$0xff] }
  0xa3   : > { %3960 = vmatprep.mubr.msk.f32.mxu1 %vm416_vm1, %v4945_v22 }
  0xa4   : > { %4182 = vmatmul.mubr.msk.f32.gmra.mrb[18].mxu0 %vm416_vm1, %v4953_v25 }
  0xa5   : > { %4184 = vmatprep.mubr.msk.f32.mxu0 %vm416_vm1, %v4991_v10 }
  0xa6   : > { %3961 = vmatmul.mubr.msk.f32.gmra.mrb[4].mxu1 %vm416_vm1, %v5933_v4 }
  0xa7   : > { %3963 = vmatprep.mubr.msk.f32.mxu1 %vm416_vm1, %v5934_v12 }
  0xa8   : > { %4185 = vmatmul.mubr.msk.f32.gmra.mrb[20].mxu0 %vm416_vm1, %v4994_v11 }
  0xa9   : > { %4187 = vmatprep.mubr.msk.f32.mxu0 %vm416_vm1, %v5027_v46 }
  0xaa   : > { %3964 = vmatmul.mubr.msk.f32.gmra.mrb[6].mxu1 %vm416_vm1, %v5935_v47 }
  0xab   : > { %3966 = vmatprep.mubr.msk.f32.mxu1 %vm416_vm1, %v5936_v0 }
  0xac   : > { %4188 = vmatmul.mubr.msk.f32.gmra.mrb[22].mxu0 %vm416_vm1, %v5030_v13 }
  0xad   : > { %4190 = vmatprep.mubr.msk.f32.mxu0 %vm416_vm1, %v5062_v21 }
  0xae   : > { %3967 = vmatmul.mubr.msk.f32.gmra.mrb[8].mxu1 %vm416_vm1, %v5937_v24 }
  0xaf   : > { %3969 = vmatprep.mubr.msk.f32.mxu1 %vm416_vm1, %v5938_v57 }
  0xb0   : > { %4191 = vmatmul.mubr.msk.f32.gmra.mrb[24].mxu0 %vm416_vm1, %v5065_v54 }
  0xb1   : > { %4193 = vmatprep.mubr.msk.f32.mxu0 %vm416_vm1, %v5097_v39 }
  0xb2   : > { %3970 = vmatmul.mubr.msk.f32.gmra.mrb[10].mxu1 %vm416_vm1, %v5939_v31 }
  0xb3   : > { %3972 = vmatprep.mubr.msk.f32.mxu1 %vm416_vm1, %v5092_v20 }
  0xb4   : > { %4194 = vmatmul.mubr.msk.f32.gmra.mrb[26].mxu0 %vm416_vm1, %v5100_v44  ;;  %v5944_v44 = vld [vmem:[#allocation7_spill] sm:$0xff] }
  0xb5   : > { %4196 = vmatprep.mubr.msk.f32.mxu0 %vm416_vm1, %v5270_v9 }
  0xb6   : > { %3973 = vmatmul.mubr.msk.f32.gmra.mrb[12].mxu1 %vm416_vm1, %v5940_v36 }
  0xb7   : > { %3975 = vmatprep.mubr.msk.f32.mxu1 %vm416_vm1, %v5127_v38 }
  0xb8   : > { %4197 = vmatmul.mubr.msk.f32.gmra.mrb[28].mxu0 %vm416_vm1, %v5273_v7 }
  0xb9   : > { %4199 = vmatprep.mubr.msk.f32.mxu0 %vm416_vm1, %v5452_v37 }
  0xba   : > { %3976 = vmatmul.mubr.msk.f32.gmra.mrb[14].mxu1 %vm416_vm1, %v5144_v40 }
  0xbb   : > { %3978 = vmatprep.mubr.msk.f32.mxu1 %vm416_vm1, %v5151_v14 }
  0xbc   : > { %4200 = vmatmul.mubr.msk.f32.gmra.mrb[30].mxu0 %vm416_vm1, %v5463_v63 }
  0xbd   : > { %4204 = vmatprep.mubr.msk.f32.mxu0 %vm416_vm1, %v5941_v3  ;;  %v5945_v3 = vld [vmem:[#allocation8_spill] sm:$0xff] }
  0xbe   : > { %3979 = vmatmul.mubr.msk.f32.gmra.mrb[16].mxu1 %vm416_vm1, %v5167_v18 }
  0xbf   : > { %3981 = vmatprep.mubr.msk.f32.mxu1 %vm416_vm1, %v5171_v61 }
  0xc0   : > { %4205 = vmatmul.mubr.msk.f32.vlgmr.msra.gmra.mrb[0].mxu0 %vm416_vm1, %v5942_v5  ;;  %v5946_v5 = vld [vmem:[#allocation9_spill] sm:$0xff] }
  0xc1   : > { %4253 = vmatpush3.msra.mxu0 %v5332_v28  ;;  %4207 = vmatprep.mubr.msk.f32.mxu0 %vm416_vm1, %v5943_v62  ;;  %v5947_v62 = vld [vmem:[#allocation10_spill] sm:$0xff]  ;;  %v5949_v28 = vld [vmem:[#allocation12_spill] sm:$0xff] }
  0xc2   : > { %3982 = vmatmul.mubr.msk.f32.gmra.mrb[18].mxu1 %vm416_vm1, %v5184_v45 }
  0xc3   : > { %3984 = vmatprep.mubr.msk.f32.mxu1 %vm416_vm1, %v5188_v1 }
  0xc4   : > { %4208 = vmatmul.mubr.msk.f32.gmra.mrb[2].mxu0 %vm416_vm1, %v5944_v44  ;;  %v5948_v44 = vld [vmem:[#allocation11_spill] sm:$0xff] }
  0xc5   : > { %4210 = vmatprep.mubr.msk.f32.mxu0 %vm416_vm1, %v5945_v3  ;;  %v5950_v3 = vld [vmem:[#allocation42_spill] sm:$0xff] }
  0xc6   : > { %3985 = vmatmul.mubr.msk.f32.gmra.mrb[20].mxu1 %vm416_vm1, %v5207_v17 }
  0xc7   : > { %3987 = vmatprep.mubr.msk.f32.mxu1 %vm416_vm1, %v5211_v49  ;;  %v5952_v49 = vld [vmem:[#allocation43_spill] sm:$0xff] }
  0xc8   : > { %4211 = vmatmul.mubr.msk.f32.gmra.mrb[4].mxu0 %vm416_vm1, %v5946_v5  ;;  %v5951_v5 = vld [vmem:[#allocation13_spill] sm:$0xff] }
  0xc9   : > { %4213 = vmatprep.mubr.msk.f32.mxu0 %vm416_vm1, %v5947_v62  ;;  %v5953_v62 = vld [vmem:[#allocation14_spill] sm:$0xff] }
  0xca   : > { %3988 = vmatmul.mubr.msk.f32.gmra.mrb[22].mxu1 %vm416_vm1, %v5225_v56 }
  0xcb   : > { %3990 = vmatprep.mubr.msk.f32.mxu1 %vm416_vm1, %v5229_v15 }
  0xcc   : > { %4214 = vmatmul.mubr.msk.f32.gmra.mrb[6].mxu0 %vm416_vm1, %v5948_v44  ;;  %v5954_v44 = vld [vmem:[#allocation15_spill] sm:$0xff] }
  0xcd   : > { %4216 = vmatprep.mubr.msk.f32.mxu0 %vm416_vm1, %v5949_v28  ;;  %v5955_v28 = vld [vmem:[#allocation16_spill] sm:$0xff] }
  0xce   : > { %3991 = vmatmul.mubr.msk.f32.gmra.mrb[24].mxu1 %vm416_vm1, %v5950_v3 }
  0xcf   : > { %3993 = vmatprep.mubr.msk.f32.mxu1 %vm416_vm1, %v5952_v49 }
  0xd0   : > { %4217 = vmatmul.mubr.msk.f32.gmra.mrb[8].mxu0 %vm416_vm1, %v5951_v5  ;;  %v5956_v5 = vld [vmem:[#allocation17_spill] sm:$0xff] }
  0xd1   : > { %4219 = vmatprep.mubr.msk.f32.mxu0 %vm416_vm1, %v5953_v62  ;;  %v5957_v62 = vld [vmem:[#allocation18_spill] sm:$0xff] }
  0xd2   : > { %3994 = vmatmul.mubr.msk.f32.gmra.mrb[26].mxu1 %vm416_vm1, %v5259_v35  ;;  %v5588_v35 = vld [vmem:[%s4657_s24 + $0x1a8] sm:$0x3] }
  0xd3   : > { %3996 = vmatprep.mubr.msk.f32.mxu1 %vm416_vm1, %v5263_v34  ;;  %v5959_v34 = vld [vmem:[#allocation2_spill] sm:$0xff] }
  0xd4   : > { %4220 = vmatmul.mubr.msk.f32.gmra.mrb[10].mxu0 %vm416_vm1, %v5954_v44  ;;  %v5958_v44 = vld [vmem:[#allocation19_spill] sm:$0xff] }
  0xd5   : > { %4222 = vmatprep.mubr.msk.f32.mxu0 %vm416_vm1, %v5955_v28  ;;  %v5960_v28 = vld [vmem:[#allocation21_spill] sm:$0xff] }
  0xd6   : > { %3997 = vmatmul.mubr.msk.f32.gmra.mrb[28].mxu1 %vm416_vm1, %v5282_v60  ;;  %v5961_v60 = vld [vmem:[#allocation3_spill] sm:$0xff] }
  0xd7   : > { %3999 = vmatprep.mubr.msk.f32.mxu1 %vm416_vm1, %v5286_v43  ;;  %v5970_v43 = vld [vmem:[#allocation38_spill] sm:$0xff] }
  0xd8   : > { %4223 = vmatmul.mubr.msk.f32.gmra.mrb[12].mxu0 %vm416_vm1, %v5956_v5  ;;  %v5962_v5 = vld [vmem:[#allocation23_spill] sm:$0xff] }
  0xd9   : > { %4225 = vmatprep.mubr.msk.f32.mxu0 %vm416_vm1, %v5957_v62 }
  0xda   : > { %4000 = vmatmul.mubr.msk.f32.gmra.mrb[30].mxu1 %vm416_vm1, %v5302_v48  ;;  %v5963_v48 = vld [vmem:[#allocation25_spill] sm:$0xff] }
  0xdb   : > { %4004 = vmatprep.mubr.msk.f32.mxu1 %vm416_vm1, %v5959_v34  ;;  %v5964_v34 = vld [vmem:[#allocation27_spill] sm:$0xff] }
  0xdc   : > { %4226 = vmatmul.mubr.msk.f32.gmra.mrb[14].mxu0 %vm416_vm1, %v5958_v44 }
  0xdd   : > { %4228 = vmatprep.mubr.msk.f32.mxu0 %vm416_vm1, %v5960_v28 }
  0xde   : > { %4005 = vmatmul.mubr.msk.f32.vlgmr.msra.gmra.mrb[0].mxu1 %vm416_vm1, %v5961_v60  ;;  %v5965_v60 = vld [vmem:[#allocation29_spill] sm:$0xff] }
  0xdf   : > { %4303 = vmatpush3.msra.mxu1 %v4668_v2  ;;  %4007 = vmatprep.mubr.msk.f32.mxu1 %vm416_vm1, %v4702_v16  ;;  %v5966_v2 = vld [vmem:[#allocation31_spill] sm:$0xff]  ;;  %v5967_v16 = vld [vmem:[#allocation33_spill] sm:$0xff] }
  0xe0   : > { %4229 = vmatmul.mubr.msk.f32.gmra.mrb[16].mxu0 %vm416_vm1, %v5962_v5 }
  0xe1   : > { %4231 = vmatprep.mubr.msk.f32.mxu0 %vm416_vm1, %v5963_v48 }
  0xe2   : > { %4008 = vmatmul.mubr.msk.f32.gmra.mrb[2].mxu1 %vm416_vm1, %v4707_v19  ;;  %v5968_v19 = vld [vmem:[#allocation35_spill] sm:$0xff] }
  0xe3   : > { %4010 = vmatprep.mubr.msk.f32.mxu1 %vm416_vm1, %v4719_v26  ;;  %v5969_v26 = vld [vmem:[#allocation37_spill] sm:$0xff] }
  0xe4   : > { %4232 = vmatmul.mubr.msk.f32.gmra.mrb[18].mxu0 %vm416_vm1, %v5964_v34 }
  0xe5   : > { %4234 = vmatprep.mubr.msk.f32.mxu0 %vm416_vm1, %v5965_v60 }
  0xe6   : > { %4011 = vmatmul.mubr.msk.f32.gmra.mrb[4].mxu1 %vm416_vm1, %v4722_v27  ;;  %v1661_v27 = vrot.slane %v5270_v9, 1 }
  0xe7   : > { %4013 = vmatprep.mubr.msk.f32.mxu1 %vm416_vm1, %v4733_v32  ;;  %v1662_v32 = vrot.slane %v5273_v7, 1 }
  0xe8   : > { %4235 = vmatmul.mubr.msk.f32.gmra.mrb[20].mxu0 %vm416_vm1, %v5966_v2 }
  0xe9   : > { %4237 = vmatprep.mubr.msk.f32.mxu0 %vm416_vm1, %v5967_v16  ;;  %v5585_v16 = vsel %vm335_vm0, %v1661_v27, %v1662_v32 }
  0xea   : > { %4014 = vmatmul.mubr.msk.f32.gmra.mrb[6].mxu1 %vm416_vm1, %v4736_v33  ;;  %v5971_v33 = vld [vmem:[#allocation39_spill] sm:$0xff] }
  0xeb   : > { %4016 = vmatprep.mubr.msk.f32.mxu1 %vm416_vm1, %v4759_v41  ;;  %v1664_v41 = vrot.slane %v5291_v52, 1  ;;  %v2460_v52 = vrot.slane %v5588_v35, 1 }
  0xec   : > { %4238 = vmatmul.mubr.msk.f32.gmra.mrb[22].mxu0 %vm416_vm1, %v5968_v19  ;;  %v2458_v19 = vrot.slane %v5463_v63, 1 }
  0xed   : > { %4240 = vmatprep.mubr.msk.f32.mxu0 %vm416_vm1, %v5969_v26  ;;  %v2457_v26 = vrot.slane %v5452_v37, 1 }
  0xee   : > { %4017 = vmatmul.mubr.msk.f32.gmra.mrb[8].mxu1 %vm416_vm1, %v4762_v42  ;;  %v5972_v42 = vld [vmem:[#allocation40_spill] sm:$0xff] }
  0xef   : > { %4019 = vmatprep.mubr.msk.f32.mxu1 %vm416_vm1, %v4791_v50  ;;  %v5599_v50 = vsel %vm335_vm0, %v1662_v32, %v1664_v41  ;;  %v2459_v27 = vsel %vm335_vm0, %v2457_v26, %v2458_v19 }
  0xf0   : > { %4241 = vmatmul.mubr.msk.f32.gmra.mrb[24].mxu0 %vm416_vm1, %v5970_v43 }
  0xf1   : > { %4243 = vmatprep.mubr.msk.f32.mxu0 %vm416_vm1, %v5971_v33 }
  0xf2   : > { %4020 = vmatmul.mubr.msk.f32.gmra.mrb[10].mxu1 %vm416_vm1, %v4794_v51  ;;  %v2461_v51 = vsel %vm335_vm0, %v2458_v19, %v2460_v52 }
  0xf3   : > { %4022 = vmatprep.mubr.msk.f32.mxu1 %vm416_vm1, %v4817_v58  ;;  %v5976_v58 = vld [vmem:[#allocation33_spill] sm:$0xff] }
  0xf4   : > { %4244 = vmatmul.mubr.msk.f32.gmra.mrb[26].mxu0 %vm416_vm1, %v5972_v42 }
  0xf5   : > { %4246 = vmatprep.mubr.msk.f32.mxu0 %vm416_vm1, %v5585_v16 }
  0xf6   : > { %4023 = vmatmul.mubr.msk.f32.gmra.mrb[12].mxu1 %vm416_vm1, %v4820_v59  ;;  %v5977_v59 = vld [vmem:[#allocation45_spill] sm:$0xff] }
  0xf7   : > { %4025 = vmatprep.mubr.msk.f32.mxu1 %vm416_vm1, %v4849_v6  ;;  %v5978_v6 = vld [vmem:[#allocation35_spill] sm:$0xff] }
  0xf8   : > { %4247 = vmatmul.mubr.msk.f32.gmra.mrb[28].mxu0 %vm416_vm1, %v5599_v50 }
  0xf9   : > { %4249 = vmatprep.mubr.msk.f32.mxu0 %vm416_vm1, %v2459_v27 }
  0xfa   : > { %4026 = vmatmul.mubr.msk.f32.gmra.mrb[14].mxu1 %vm416_vm1, %v4852_v8  ;;  %v5979_v8 = vld [vmem:[#allocation46_spill] sm:$0xff] }
  0xfb   : > { %4028 = vmatprep.mubr.msk.f32.mxu1 %vm416_vm1, %v4890_v29  ;;  %v2723_v29 = vrot.slane %v5452_v37, 2 }
  0xfc   : > { %4250 = vmatmul.mubr.msk.f32.gmra.mrb[30].mxu0 %vm416_vm1, %v2461_v51 }
  0xfd   : > { %4254 = vmatprep.mubr.msk.f32.mxu0 %vm416_vm1, %v4945_v22  ;;  %v2726_v22 = vrot.slane %v5588_v35, 2 }
  0xfe   : > { %4029 = vmatmul.mubr.msk.f32.gmra.mrb[16].mxu1 %vm416_vm1, %v4893_v30  ;;  %v2724_v30 = vrot.slane %v5463_v63, 2 }
  0xff   : > { %4031 = vmatprep.mubr.msk.f32.mxu1 %vm416_vm1, %v4918_v53  ;;  %v5982_v53 = vld [vmem:[#allocation48_spill] sm:$0xff] }
 0x100   : > { %4255 = vmatmul.mubr.msk.f32.vlgmr.msra.gmra.mrb[0].mxu0 %vm416_vm1, %v5933_v4 }
 0x101   : > { %4257 = vmatprep.mubr.msk.f32.mxu0 %vm416_vm1, %v5934_v12 }
 0x102   : > { %4032 = vmatmul.mubr.msk.f32.gmra.mrb[18].mxu1 %vm416_vm1, %v4921_v55  ;;  %v5983_v55 = vld [vmem:[#allocation49_spill] sm:$0xff] }
 0x103   : > { %4034 = vmatprep.mubr.msk.f32.mxu1 %vm416_vm1, %v4950_v23  ;;  %v5981_v23 = vld [vmem:[#allocation47_spill] sm:$0xff] }
 0x104   : > { %4258 = vmatmul.mubr.msk.f32.gmra.mrb[2].mxu0 %vm416_vm1, %v5935_v47 }
 0x105   : > { %4260 = vmatprep.mubr.msk.f32.mxu0 %vm416_vm1, %v5936_v0 }
 0x106   : > { %4035 = vmatmul.mubr.msk.f32.gmra.mrb[20].mxu1 %vm416_vm1, %v4953_v25  ;;  %v2725_v25 = vsel %vm995_vm2, %v2723_v29, %v2724_v30 }
 0x107   : > { %4037 = vmatprep.mubr.msk.f32.mxu1 %vm416_vm1, %v4991_v10  ;;  %v5980_v10 = vld [vmem:[#allocation37_spill] sm:$0xff] }
 0x108   : > { %4261 = vmatmul.mubr.msk.f32.gmra.mrb[4].mxu0 %vm416_vm1, %v5937_v24 }
 0x109   : > { %4263 = vmatprep.mubr.msk.f32.mxu0 %vm416_vm1, %v5938_v57 }
 0x10a   : > { %4038 = vmatmul.mubr.msk.f32.gmra.mrb[22].mxu1 %vm416_vm1, %v4994_v11  ;;  %v5984_v11 = vld [vmem:[#allocation50_spill] sm:$0xff] }
 0x10b   : > { %4040 = vmatprep.mubr.msk.f32.mxu1 %vm416_vm1, %v5027_v46  ;;  %v5973_v46 = vld [vmem:[#allocation34_spill] sm:$0xff] }
 0x10c   : > { %4264 = vmatmul.mubr.msk.f32.gmra.mrb[6].mxu0 %vm416_vm1, %v5939_v31 }
 0x10d   : > { %4266 = vmatprep.mubr.msk.f32.mxu0 %vm416_vm1, %v5092_v20 }
 0x10e   : > { %4041 = vmatmul.mubr.msk.f32.gmra.mrb[24].mxu1 %vm416_vm1, %v5030_v13  ;;  %v2727_v13 = vsel %vm995_vm2, %v2724_v30, %v2726_v22 }
 0x10f   : > { %4043 = vmatprep.mubr.msk.f32.mxu1 %vm416_vm1, %v5062_v21 }
 0x110   : > { %4267 = vmatmul.mubr.msk.f32.gmra.mrb[8].mxu0 %vm416_vm1, %v5940_v36 }
 0x111   : > { %4269 = vmatprep.mubr.msk.f32.mxu0 %vm416_vm1, %v5127_v38 }
 0x112   : > { %4044 = vmatmul.mubr.msk.f32.gmra.mrb[26].mxu1 %vm416_vm1, %v5065_v54 }
 0x113   : > { %4046 = vmatprep.mubr.msk.f32.mxu1 %vm416_vm1, %v5097_v39 }
 0x114   : > { %4270 = vmatmul.mubr.msk.f32.gmra.mrb[10].mxu0 %vm416_vm1, %v5144_v40 }
 0x115   : > { %4272 = vmatprep.mubr.msk.f32.mxu0 %vm416_vm1, %v5151_v14 }
 0x116   : > { %4047 = vmatmul.mubr.msk.f32.gmra.mrb[28].mxu1 %vm416_vm1, %v5973_v46 }
 0x117   : > { %4049 = vmatprep.mubr.msk.f32.mxu1 %vm416_vm1, %v5270_v9  ;;  %v5974_v9 = vld [vmem:[#allocation41_spill] sm:$0xff] }
 0x118   : > { %4273 = vmatmul.mubr.msk.f32.gmra.mrb[12].mxu0 %vm416_vm1, %v5167_v18 }
 0x119   : > { %4275 = vmatprep.mubr.msk.f32.mxu0 %vm416_vm1, %v5171_v61 }
 0x11a   : > { %4050 = vmatmul.mubr.msk.f32.gmra.mrb[30].mxu1 %vm416_vm1, %v5273_v7  ;;  %v5975_v7 = vld [vmem:[#allocation44_spill] sm:$0xff] }
 0x11b   : > { %4078 = vmatprep.mubr.msk.f32.mxu1 %vm416_vm1, %v5957_v62 }
 0x11c   : > { %4276 = vmatmul.mubr.msk.f32.gmra.mrb[14].mxu0 %vm416_vm1, %v5184_v45 }
 0x11d   : > { %4278 = vmatprep.mubr.msk.f32.mxu0 %vm416_vm1, %v5188_v1 }
 0x11e   : > { %4079 = vmatmul.mubr.msk.f32.vlgmr.msra.gmra.mrb[16].mxu1 %vm416_vm1, %v5958_v44 }
 0x11f   : > { %4081 = vmatprep.mubr.msk.f32.mxu1 %vm416_vm1, %v5960_v28 }
 0x120   : > { %4279 = vmatmul.mubr.msk.f32.gmra.mrb[16].mxu0 %vm416_vm1, %v5207_v17 }
 0x121   : > { %4281 = vmatprep.mubr.msk.f32.mxu0 %vm416_vm1, %v5974_v9 }
 0x122   : > { %4082 = vmatmul.mubr.msk.f32.gmra.mrb[18].mxu1 %vm416_vm1, %v5962_v5 }
 0x123   : > { %4084 = vmatprep.mubr.msk.f32.mxu1 %vm416_vm1, %v5963_v48 }
 0x124   : > { %4282 = vmatmul.mubr.msk.f32.gmra.mrb[18].mxu0 %vm416_vm1, %v5225_v56 }
 0x125   : > { %4284 = vmatprep.mubr.msk.f32.mxu0 %vm416_vm1, %v5229_v15 }
 0x126   : > { %4085 = vmatmul.mubr.msk.f32.gmra.mrb[20].mxu1 %vm416_vm1, %v5964_v34 }
 0x127   : > { %4087 = vmatprep.mubr.msk.f32.mxu1 %vm416_vm1, %v5965_v60 }
 0x128   : > { %4285 = vmatmul.mubr.msk.f32.gmra.mrb[20].mxu0 %vm416_vm1, %v5950_v3 }
 0x129   : > { %4287 = vmatprep.mubr.msk.f32.mxu0 %vm416_vm1, %v5952_v49 }
 0x12a   : > { %4088 = vmatmul.mubr.msk.f32.gmra.mrb[22].mxu1 %vm416_vm1, %v5966_v2 }
 0x12b   : > { %4090 = vmatprep.mubr.msk.f32.mxu1 %vm416_vm1, %v5976_v58 }
 0x12c   : > { %4288 = vmatmul.mubr.msk.f32.gmra.mrb[22].mxu0 %vm416_vm1, %v5975_v7 }
 0x12d   : > { %4290 = vmatprep.mubr.msk.f32.mxu0 %vm416_vm1, %v5977_v59 }
 0x12e   : > { %4091 = vmatmul.mubr.msk.f32.gmra.mrb[24].mxu1 %vm416_vm1, %v5978_v6 }
 0x12f   : > { %4093 = vmatprep.mubr.msk.f32.mxu1 %vm416_vm1, %v5980_v10 }
 0x130   : > { %4291 = vmatmul.mubr.msk.f32.gmra.mrb[24].mxu0 %vm416_vm1, %v5979_v8 }
 0x131   : > { %4293 = vmatprep.mubr.msk.f32.mxu0 %vm416_vm1, %v5981_v23 }
 0x132   : > { %4094 = vmatmul.mubr.msk.f32.gmra.mrb[26].mxu1 %vm416_vm1, %v5970_v43 }
 0x133   : > { %4096 = vmatprep.mubr.msk.f32.mxu1 %vm416_vm1, %v5971_v33 }
 0x134   : > { %4294 = vmatmul.mubr.msk.f32.gmra.mrb[26].mxu0 %vm416_vm1, %v5982_v53 }
 0x135   : > { %4296 = vmatprep.mubr.msk.f32.mxu0 %vm416_vm1, %v5983_v55 }
 0x136   : > { %4097 = vmatmul.mubr.msk.f32.gmra.mrb[28].mxu1 %vm416_vm1, %v5972_v42 }
 0x137   : > { %4099 = vmatprep.mubr.msk.f32.mxu1 %vm416_vm1, %v5585_v16 }
 0x138   : > { %4297 = vmatmul.mubr.msk.f32.gmra.mrb[28].mxu0 %vm416_vm1, %v5984_v11 }
 0x139   : > { %4299 = vmatprep.mubr.msk.f32.mxu0 %vm416_vm1, %v2725_v25 }
 0x13a   : > { %4100 = vmatmul.mubr.msk.f32.gmra.mrb[30].mxu1 %vm416_vm1, %v5599_v50 }
 0x13c   : > { %4300 = vmatmul.mubr.msk.f32.gmra.mrb[30].mxu0 %vm416_vm1, %v2727_v13 }
 0x1b1   : > { %v4006_v39 = vpop.f32.mrb[0].mxu1 }
 0x1b2   : > { %v1469_v21 = vpop.f32.mrb[1].mxu1 }
 0x1b5   : > { %v4009_v54 = vpop.f32.mrb[2].mxu1 }
 0x1b6   : > { %v1479_v20 = vpop.f32.mrb[3].mxu1 }
 0x1b9   : > { %v4012_v14 = vpop.f32.mrb[4].mxu1 }
 0x1ba   : > { %v1489_v38 = vpop.f32.mrb[5].mxu1 }
 0x1bd   : > { %v4015_v40 = vpop.f32.mrb[6].mxu1 }
 0x1be   : > { %v1499_v18 = vpop.f32.mrb[7].mxu1 }
 0x1c1   : > { %v4018_v61 = vpop.f32.mrb[8].mxu1 }
 0x1c2   : > { %v1509_v45 = vpop.f32.mrb[9].mxu1 }
 0x1c5   : > { %v4021_v1 = vpop.f32.mrb[10].mxu1 }
 0x1c6   : > { %v5745_v17 = vpop.f32.mrb[11].mxu1 }
 0x1c9   : > { %v5747_v49 = vpop.f32.mrb[12].mxu1 }
 0x1ca   : > { %v5749_v56 = vpop.f32.mrb[13].mxu1 }
 0x1cd   : > { %v5751_v15 = vpop.f32.mrb[14].mxu1 }
 0x1ce   : > { %v5753_v35 = vpop.f32.mrb[15].mxu1 }
 0x1d3   : > { %v4256_v43 = vpop.f32.mrb[0].mxu0 }
 0x1d4   : > { %v4304_v48 = vadd.f32 %v4256_v43, %v4006_v39  ;;  %v2798_v4 = vpop.f32.mrb[1].mxu0 }
 0x1d5   : > { %v4305_v12 = vadd.f32 %v2798_v4, %v1469_v21 }
 0x1d6   : > { %2990 = vst [vmem:[%s4652_s21 + $0x8] sm:$0xff] %v4304_v48  ;;  %v3059_v47 = vmul.f32 %v4304_v48, %v4304_v48 }
 0x1d7   : > { %2989 = vst [vmem:[%s4652_s21] sm:$0xff] %v4305_v12  ;;  %v3021_v0 = vadd.f32 %v4305_v12, %v4304_v48  ;;  %v3058_v24 = vmul.f32 %v4305_v12, %v4305_v12  ;;  %v4259_v57 = vpop.f32.mrb[2].mxu0 }
 0x1d8   : > { %v4306_v31 = vadd.f32 %v4259_v57, %v4009_v54  ;;  %v2808_v37 = vpop.f32.mrb[3].mxu0 }
 0x1d9   : > { %v3090_v36 = vadd.f32 %v3059_v47, %v3058_v24  ;;  %v4307_v63 = vadd.f32 %v2808_v37, %v1479_v20 }
 0x1da   : > { %2992 = vst [vmem:[%s4652_s21 + $0x18] sm:$0xff] %v4306_v31  ;;  %v3061_v34 = vmul.f32 %v4306_v31, %v4306_v31 }
 0x1db   : > { %2991 = vst [vmem:[%s4652_s21 + $0x10] sm:$0xff] %v4307_v63  ;;  %v3022_v3 = vadd.f32 %v4307_v63, %v3021_v0  ;;  %v3060_v62 = vmul.f32 %v4307_v63, %v4307_v63  ;;  %v4262_v44 = vpop.f32.mrb[4].mxu0 }
 0x1dc   : > { %v4308_v28 = vadd.f32 %v4262_v44, %v4012_v14  ;;  %v2818_v5 = vpop.f32.mrb[5].mxu0 }
 0x1dd   : > { %v3091_v60 = vadd.f32 %v3090_v36, %v3060_v62  ;;  %v4309_v2 = vadd.f32 %v2818_v5, %v1489_v38  ;;  %v3023_v16 = vadd.f32 %v4306_v31, %v3022_v3 }
 0x1de   : > { %2994 = vst [vmem:[%s4652_s21 + $0x28] sm:$0xff] %v4308_v28  ;;  %v3063_v50 = vmul.f32 %v4308_v28, %v4308_v28 }
 0x1df   : > { %2993 = vst [vmem:[%s4652_s21 + $0x20] sm:$0xff] %v4309_v2  ;;  %v3024_v19 = vadd.f32 %v4309_v2, %v3023_v16  ;;  %v3062_v26 = vmul.f32 %v4309_v2, %v4309_v2  ;;  %v3092_v32 = vadd.f32 %v3091_v60, %v3061_v34  ;;  %v4265_v33 = vpop.f32.mrb[6].mxu0 }
 0x1e0   : > { %v4310_v41 = vadd.f32 %v4265_v33, %v4015_v40  ;;  %v2828_v42 = vpop.f32.mrb[7].mxu0 }
 0x1e1   : > { %v3093_v52 = vadd.f32 %v3092_v32, %v3062_v26  ;;  %v4311_v27 = vadd.f32 %v2828_v42, %v1499_v18  ;;  %v3025_v51 = vadd.f32 %v4308_v28, %v3024_v19 }
 0x1e2   : > { %2996 = vst [vmem:[%s4652_s21 + $0x38] sm:$0xff] %v4310_v41  ;;  %v3065_v8 = vmul.f32 %v4310_v41, %v4310_v41 }
 0x1e3   : > { %2995 = vst [vmem:[%s4652_s21 + $0x30] sm:$0xff] %v4311_v27  ;;  %v3026_v46 = vadd.f32 %v4311_v27, %v3025_v51  ;;  %v3064_v9 = vmul.f32 %v4311_v27, %v4311_v27  ;;  %v3094_v7 = vadd.f32 %v3093_v52, %v3063_v50  ;;  %v4268_v58 = vpop.f32.mrb[8].mxu0 }
 0x1e4   : > { %v4312_v59 = vadd.f32 %v4268_v58, %v4018_v61  ;;  %v2838_v6 = vpop.f32.mrb[9].mxu0 }
 0x1e5   : > { %v3095_v10 = vadd.f32 %v3094_v7, %v3064_v9  ;;  %v4313_v23 = vadd.f32 %v2838_v6, %v1509_v45  ;;  %v3027_v29 = vadd.f32 %v4310_v41, %v3026_v46 }
 0x1e6   : > { %2998 = vst [vmem:[%s4652_s21 + $0x48] sm:$0xff] %v4312_v59  ;;  %v3067_v13 = vmul.f32 %v4312_v59, %v4312_v59 }
 0x1e7   : > { %2997 = vst [vmem:[%s4652_s21 + $0x40] sm:$0xff] %v4313_v23  ;;  %v3028_v30 = vadd.f32 %v4313_v23, %v3027_v29  ;;  %v3066_v53 = vmul.f32 %v4313_v23, %v4313_v23  ;;  %v3096_v55 = vadd.f32 %v3095_v10, %v3065_v8  ;;  %v4271_v22 = vpop.f32.mrb[10].mxu0 }
 0x1e8   : > { %v4314_v25 = vadd.f32 %v4271_v22, %v4021_v1  ;;  %v2848_v11 = vpop.f32.mrb[11].mxu0 }
 0x1e9   : > { %v3097_v39 = vadd.f32 %v3096_v55, %v3066_v53  ;;  %v4315_v21 = vadd.f32 %v2848_v11, %v5745_v17  ;;  %v3029_v54 = vadd.f32 %v4312_v59, %v3028_v30 }
 0x1ea   : > { %3000 = vst [vmem:[%s4652_s21 + $0x58] sm:$0xff] %v4314_v25  ;;  %v3069_v45 = vmul.f32 %v4314_v25, %v4314_v25 }
 0x1eb   : > { %2999 = vst [vmem:[%s4652_s21 + $0x50] sm:$0xff] %v4315_v21  ;;  %v3030_v20 = vadd.f32 %v4315_v21, %v3029_v54  ;;  %v3068_v14 = vmul.f32 %v4315_v21, %v4315_v21  ;;  %v3098_v38 = vadd.f32 %v3097_v39, %v3067_v13  ;;  %v4274_v40 = vpop.f32.mrb[12].mxu0 }
 0x1ec   : > { %v4316_v18 = vadd.f32 %v4274_v40, %v5747_v49  ;;  %v2858_v61 = vpop.f32.mrb[13].mxu0 }
 0x1ed   : > { %v3099_v1 = vadd.f32 %v3098_v38, %v3068_v14  ;;  %v4317_v43 = vadd.f32 %v2858_v61, %v5749_v56  ;;  %v3031_v48 = vadd.f32 %v4314_v25, %v3030_v20 }
 0x1ee   : > { %3002 = vst [vmem:[%s4652_s21 + $0x68] sm:$0xff] %v4316_v18  ;;  %v3071_v57 = vmul.f32 %v4316_v18, %v4316_v18 }
 0x1ef   : > { %3001 = vst [vmem:[%s4652_s21 + $0x60] sm:$0xff] %v4317_v43  ;;  %v3032_v17 = vadd.f32 %v4317_v43, %v3031_v48  ;;  %v3070_v4 = vmul.f32 %v4317_v43, %v4317_v43  ;;  %v3100_v12 = vadd.f32 %v3099_v1, %v3069_v45  ;;  %v4277_v47 = vpop.f32.mrb[14].mxu0 }
 0x1f0   : > { %v4318_v0 = vadd.f32 %v4277_v47, %v5751_v15  ;;  %v2868_v24 = vpop.f32.mrb[15].mxu0 }
 0x1f1   : > { %v3101_v31 = vadd.f32 %v3100_v12, %v3070_v4  ;;  %v4319_v49 = vadd.f32 %v2868_v24, %v5753_v35  ;;  %v3033_v37 = vadd.f32 %v4316_v18, %v3032_v17  ;;  %v4080_v56 = vpop.f32.mrb[16].mxu1 }
 0x1f2   : > { %3004 = vst [vmem:[%s4652_s21 + $0x78] sm:$0xff] %v4318_v0  ;;  %v1816_v44 = vpop.f32.mrb[17].mxu1  ;;  %v3073_v34 = vmul.f32 %v4318_v0, %v4318_v0 }
 0x1f3   : > { %3003 = vst [vmem:[%s4652_s21 + $0x70] sm:$0xff] %v4319_v49  ;;  %v3034_v36 = vadd.f32 %v4319_v49, %v3033_v37  ;;  %v3072_v63 = vmul.f32 %v4319_v49, %v4319_v49  ;;  %v3102_v3 = vadd.f32 %v3101_v31, %v3071_v57  ;;  %v4280_v62 = vpop.f32.mrb[16].mxu0 }
 0x1f4   : > { %v4320_v28 = vadd.f32 %v4280_v62, %v4080_v56  ;;  %v2878_v5 = vpop.f32.mrb[17].mxu0 }
 0x1f5   : > { %v3103_v15 = vadd.f32 %v3102_v3, %v3072_v63  ;;  %v4321_v60 = vadd.f32 %v2878_v5, %v1816_v44  ;;  %v3035_v2 = vadd.f32 %v4318_v0, %v3034_v36  ;;  %v4083_v35 = vpop.f32.mrb[18].mxu1 }
 0x1f6   : > { %3006 = vst [vmem:[%s4652_s21 + $0x88] sm:$0xff] %v4320_v28  ;;  %v1826_v33 = vpop.f32.mrb[19].mxu1  ;;  %v3075_v50 = vmul.f32 %v4320_v28, %v4320_v28 }
 0x1f7   : > { %3005 = vst [vmem:[%s4652_s21 + $0x80] sm:$0xff] %v4321_v60  ;;  %v3036_v16 = vadd.f32 %v4321_v60, %v3035_v2  ;;  %v3074_v19 = vmul.f32 %v4321_v60, %v4321_v60  ;;  %v3104_v26 = vadd.f32 %v3103_v15, %v3073_v34  ;;  %v4283_v32 = vpop.f32.mrb[18].mxu0 }
 0x1f8   : > { %v4322_v41 = vadd.f32 %v4283_v32, %v4083_v35  ;;  %v2888_v42 = vpop.f32.mrb[19].mxu0 }
 0x1f9   : > { %v3105_v52 = vadd.f32 %v3104_v26, %v3074_v19  ;;  %v4323_v27 = vadd.f32 %v2888_v42, %v1826_v33  ;;  %v3037_v51 = vadd.f32 %v4320_v28, %v3036_v16  ;;  %v4086_v46 = vpop.f32.mrb[20].mxu1 }
 0x1fa   : > { %3008 = vst [vmem:[%s4652_s21 + $0x98] sm:$0xff] %v4322_v41  ;;  %v1836_v6 = vpop.f32.mrb[21].mxu1  ;;  %v3077_v23 = vmul.f32 %v4322_v41, %v4322_v41 }
 0x1fb   : > { %3007 = vst [vmem:[%s4652_s21 + $0x90] sm:$0xff] %v4323_v27  ;;  %v3038_v9 = vadd.f32 %v4323_v27, %v3037_v51  ;;  %v3076_v7 = vmul.f32 %v4323_v27, %v4323_v27  ;;  %v3106_v58 = vadd.f32 %v3105_v52, %v3075_v50  ;;  %v4286_v59 = vpop.f32.mrb[20].mxu0 }
 0x1fc   : > { %v4324_v8 = vadd.f32 %v4286_v59, %v4086_v46  ;;  %v2898_v10 = vpop.f32.mrb[21].mxu0 }
 0x1fd   : > { %v3107_v29 = vadd.f32 %v3106_v58, %v3076_v7  ;;  %v4325_v30 = vadd.f32 %v2898_v10, %v1836_v6  ;;  %v3039_v53 = vadd.f32 %v4322_v41, %v3038_v9  ;;  %v4089_v55 = vpop.f32.mrb[22].mxu1 }
 0x1fe   : > { %3010 = vst [vmem:[%s4652_s21 + $0xa8] sm:$0xff] %v4324_v8  ;;  %v1846_v39 = vpop.f32.mrb[23].mxu1  ;;  %v3079_v20 = vmul.f32 %v4324_v8, %v4324_v8 }
 0x1ff   : > { %3009 = vst [vmem:[%s4652_s21 + $0xa0] sm:$0xff] %v4325_v30  ;;  %v3040_v22 = vadd.f32 %v4325_v30, %v3039_v53  ;;  %v3078_v25 = vmul.f32 %v4325_v30, %v4325_v30  ;;  %v3108_v11 = vadd.f32 %v3107_v29, %v3077_v23  ;;  %v4289_v13 = vpop.f32.mrb[22].mxu0 }
 0x200   : > { %v4326_v21 = vadd.f32 %v4289_v13, %v4089_v55  ;;  %v2908_v54 = vpop.f32.mrb[23].mxu0 }
 0x201   : > { %v3109_v14 = vadd.f32 %v3108_v11, %v3078_v25  ;;  %v4327_v38 = vadd.f32 %v2908_v54, %v1846_v39  ;;  %v3041_v40 = vadd.f32 %v4324_v8, %v3040_v22  ;;  %v4092_v18 = vpop.f32.mrb[24].mxu1 }
 0x202   : > { %3012 = vst [vmem:[%s4652_s21 + $0xb8] sm:$0xff] %v4326_v21  ;;  %v1856_v48 = vpop.f32.mrb[25].mxu1  ;;  %v3081_v12 = vmul.f32 %v4326_v21, %v4326_v21 }
 0x203   : > { %3011 = vst [vmem:[%s4652_s21 + $0xb0] sm:$0xff] %v4327_v38  ;;  %v3042_v61 = vadd.f32 %v4327_v38, %v3041_v40  ;;  %v3080_v45 = vmul.f32 %v4327_v38, %v4327_v38  ;;  %v3110_v1 = vadd.f32 %v3109_v14, %v3079_v20  ;;  %v4292_v43 = vpop.f32.mrb[24].mxu0 }
 0x204   : > { %v4328_v17 = vadd.f32 %v4292_v43, %v4092_v18  ;;  %v2918_v4 = vpop.f32.mrb[25].mxu0 }
 0x205   : > { %v3111_v47 = vadd.f32 %v3110_v1, %v3080_v45  ;;  %v4329_v0 = vadd.f32 %v2918_v4, %v1856_v48  ;;  %v3043_v24 = vadd.f32 %v4326_v21, %v3042_v61  ;;  %v4095_v57 = vpop.f32.mrb[26].mxu1  ;;  %v3127_v1 = vld [vmem:[%s5810_s3] sm:$0x3] }
 0x206   : > { %3014 = vst [vmem:[%s4652_s21 + $0xc8] sm:$0xff] %v4328_v17  ;;  %v1866_v36 = vpop.f32.mrb[27].mxu1  ;;  %v3083_v62 = vmul.f32 %v4328_v17, %v4328_v17 }
 0x207   : > { %3013 = vst [vmem:[%s4652_s21 + $0xc0] sm:$0xff] %v4329_v0  ;;  %v3044_v31 = vadd.f32 %v4329_v0, %v3043_v24  ;;  %v3082_v49 = vmul.f32 %v4329_v0, %v4329_v0  ;;  %v3112_v37 = vadd.f32 %v3111_v47, %v3081_v12  ;;  %v4295_v56 = vpop.f32.mrb[26].mxu0 }
 0x208   : > { %v4330_v63 = vadd.f32 %v4295_v56, %v4095_v57  ;;  %v2928_v3 = vpop.f32.mrb[27].mxu0 }
 0x209   : > { %v3113_v44 = vadd.f32 %v3112_v37, %v3082_v49  ;;  %v4331_v28 = vadd.f32 %v2928_v3, %v1866_v36  ;;  %v3045_v5 = vadd.f32 %v4328_v17, %v3044_v31  ;;  %v4098_v34 = vpop.f32.mrb[28].mxu1 }
 0x20a   : > { %3016 = vst [vmem:[%s4652_s21 + $0xd8] sm:$0xff] %v4330_v63  ;;  %v1876_v16 = vpop.f32.mrb[29].mxu1  ;;  %v3085_v32 = vmul.f32 %v4330_v63, %v4330_v63 }
 0x20b   : > { %3015 = vst [vmem:[%s4652_s21 + $0xd0] sm:$0xff] %v4331_v28  ;;  %v3046_v15 = vadd.f32 %v4331_v28, %v3045_v5  ;;  %v3084_v60 = vmul.f32 %v4331_v28, %v4331_v28  ;;  %v3114_v2 = vadd.f32 %v3113_v44, %v3083_v62  ;;  %v4298_v35 = vpop.f32.mrb[28].mxu0 }
 0x20c   : > { %v4332_v19 = vadd.f32 %v4298_v35, %v4098_v34  ;;  %v2938_v26 = vpop.f32.mrb[29].mxu0 }
 0x20d   : > { %v3115_v33 = vadd.f32 %v3114_v2, %v3084_v60  ;;  %v4333_v41 = vadd.f32 %v2938_v26, %v1876_v16  ;;  %v3047_v42 = vadd.f32 %v4330_v63, %v3046_v15  ;;  %v4101_v50 = vpop.f32.mrb[30].mxu1 }
 0x20e   : > { %3018 = vst [vmem:[%s4652_s21 + $0xe8] sm:$0xff] %v4332_v19  ;;  %v1886_v9 = vpop.f32.mrb[31].mxu1  ;;  %v3087_v59 = vmul.f32 %v4332_v19, %v4332_v19 }
 0x20f   : > { %3017 = vst [vmem:[%s4652_s21 + $0xe0] sm:$0xff] %v4333_v41  ;;  %v3048_v52 = vadd.f32 %v4333_v41, %v3047_v42  ;;  %v3086_v27 = vmul.f32 %v4333_v41, %v4333_v41  ;;  %v3116_v51 = vadd.f32 %v3115_v33, %v3085_v32  ;;  %v4301_v46 = vpop.f32.mrb[30].mxu0 }
 0x210   : > { %v4334_v7 = vadd.f32 %v4301_v46, %v4101_v50  ;;  %v2948_v58 = vpop.f32.mrb[31].mxu0 }
 0x211   : > { %v3117_v6 = vadd.f32 %v3116_v51, %v3086_v27  ;;  %v4335_v8 = vadd.f32 %v2948_v58, %v1886_v9  ;;  %v3049_v10 = vadd.f32 %v4332_v19, %v3048_v52 }
 0x212   : > { %3020 = vst [vmem:[%s4652_s21 + $0xf8] sm:$0xff] %v4334_v7  ;;  %v3089_v53 = vmul.f32 %v4334_v7, %v4334_v7 }
 0x213   : > { %3019 = vst [vmem:[%s4652_s21 + $0xf0] sm:$0xff] %v4335_v8  ;;  %v3050_v23 = vadd.f32 %v4335_v8, %v3049_v10  ;;  %v3088_v29 = vmul.f32 %v4335_v8, %v4335_v8  ;;  %v3118_v30 = vadd.f32 %v3117_v6, %v3087_v59 }
 0x215   : > { %v3051_v55 = vadd.f32 %v4334_v7, %v3050_v23  ;;  %v3119_v22 = vadd.f32 %v3118_v30, %v3088_v29 }
 0x217   : > { %v3052_v25 = vrot.slane %v3051_v55, 4  ;;  %v3120_v11 = vadd.f32 %v3119_v22, %v3089_v53 }
 0x219   : > { %v3053_v13 = vadd.f32 %v3052_v25, %v3051_v55  ;;  %v3121_v39 = vrot.slane %v3120_v11, 4 }
 0x21b   : > { %v3054_v21 = vrot.slane %v3053_v13, 2  ;;  %v3122_v54 = vadd.f32 %v3121_v39, %v3120_v11 }
 0x21d   : > { %v3055_v20 = vadd.f32 %v3054_v21, %v3053_v13  ;;  %v3123_v14 = vrot.slane %v3122_v54, 2 }
 0x21f   : > { %v3056_v38 = vrot.slane %v3055_v20, 1  ;;  %v3124_v40 = vadd.f32 %v3123_v14, %v3122_v54 }
 0x221   : > { %v3125_v18 = vrot.slane %v3124_v40, 1  ;;  %v3057_v61 = vadd.f32 %v3056_v38, %v3055_v20 }
 0x223   : > { %v3126_v45 = vadd.f32 %v3125_v18, %v3124_v40 }
 0x225   : > { %v3129_v43 = vsel %vm3128_vm3, %v3057_v61, %v3126_v45 }
 0x226   : > { %v3130_v48 = vadd.f32 %v3129_v43, %v3127_v1 }
 0x228   : > { %3131 = vst [vmem:[%s5810_s3] sm:$0x3] %v3130_v48 }
 0x229 PF: > { %s14_s14 = sadd.s32 1, %s4608_s14   ;;  %s5985_s12 = smov %s4604_s13 }
 0x22a   : > { %p11_p6 = scmp.ge.s32.totalorder %s14_s14, 4   ;;  %s5986_s13 = smov %s5988_s15 }
 0x22c   :  { %13 = sbr.rel (!%p11_p6) target bundleno = 2 (0x2), region = 77 }

</bundles_post_ra>
